<compile_context>
chip_gen: v7x
topology: tpu7x:2x2x1
jax: 0.10.0
libtpu: 0.0.40
codegen_flags: <defaults>
</compile_context>

<pallas_src>
import jax
import jax.numpy as jnp
from jax.experimental import pallas as pl
from jax.experimental.pallas import tpu as pltpu

STATE_SIZE = 16
ACTION_SIZE = 8
IN_DIM = STATE_SIZE + ACTION_SIZE
IN_PAD = 128                     # input features padded to one full lane group
H1, H2, H3 = 512, 256, 128
BN_EPS = 1e-5


def _round_up(n, m):
    return ((n + m - 1) // m) * m


def _default_tb():
    """Per-generation default batch tile: 512 on v5e, 1024 on v6e/v7x."""
    try:
        kind = jax.devices()[0].device_kind.lower()
    except Exception:
        return 1024
    if "v5 lite" in kind or "v5e" in kind:
        return 512
    return 1024


def sac_critic_kernel(x_ref,
                      w1_ref, t1_ref,
                      w2_ref, t2_ref,
                      w3_ref, t3_ref,
                      w4_ref, b4_ref,
                      o_ref):
    # Layer 1: Linear (BN scale pre-folded into weights) -> shift -> ReLU
    h = jnp.dot(x_ref[...], w1_ref[...], preferred_element_type=jnp.float32)
    h = jnp.maximum(h + t1_ref[...], 0.0)

    # Layer 2 (re-cast activations to bf16 only at the MXU input)
    h = jnp.dot(h.astype(jnp.bfloat16), w2_ref[...],
                preferred_element_type=jnp.float32)
    h = jnp.maximum(h + t2_ref[...], 0.0)

    # Layer 3
    h = jnp.dot(h.astype(jnp.bfloat16), w3_ref[...],
                preferred_element_type=jnp.float32)
    h = jnp.maximum(h + t3_ref[...], 0.0)                       # (tb, 128)

    # Head (128 -> 1): VPU multiply + lane reduction (no N=1 matmul), stored
    # LANE-DENSE: o_ref block is (1, tb//128, 128) so the writeback is tb
    # contiguous f32 values instead of a masked (tb, 1) strided store.
    q = jnp.sum(h * w4_ref[...].astype(jnp.float32), axis=-1, keepdims=True)
    q = q + b4_ref[...]                                          # (tb, 1)
    o_ref[...] = q.reshape(o_ref.shape)                          # (1, tb//128, 128)


def sac_critic_forward(state, action_one_hot, params, *, tb=None):
    """state: (B, 16) f32, action_one_hot: (B, 8) int/float -> (B, 1) f32."""
    (w1, t1, w2, t2, w3, t3, w4, b4) = params
    B = state.shape[0]

    # ---- batch tile selection ------------------------------------------------
    tb_max = tb if tb is not None else _default_tb()
    tb_max = max(128, _round_up(tb_max, 128))        # lane-dense out needs tb % 128 == 0
    # Target >= 2 tiles so the "parallel" batch axis shards both v7x TensorCores
    # (no-op on v5e/v6e which have a single TC per chip).
    n_target = max(2, -(-B // tb_max))
    tb = min(tb_max, max(128, _round_up(-(-B // n_target), 128)))
    n_tiles = -(-B // tb)
    Bp = n_tiles * tb

    # ---- input assembly (one-time wrapper work) -------------------------------
    x = jnp.concatenate(
        [state.astype(jnp.float32), action_one_hot.astype(jnp.float32)], axis=1)
    # Pad rows to Bp and features to 128 lanes: each tile is one contiguous,
    # lane-aligned bf16 slab in HBM (padded zeros contribute nothing).
    x = jnp.pad(x, ((0, Bp - B), (0, IN_PAD - x.shape[1]))).astype(jnp.bfloat16)
    # Pad W1's input dim to match (zero rows).
    w1p = jnp.pad(w1, ((0, IN_PAD - w1.shape[0]), (0, 0)))

    # ---- specs ----------------------------------------------------------------
    def batch_spec(cols):
        # Streams over the batch grid axis (double-buffered by Pallas).
        return pl.BlockSpec((tb, cols), lambda i: (i, 0))

    def resident_spec(shape):
        # Full-size block, constant index_map -> loaded once, resident in VMEM.
        return pl.BlockSpec(shape, lambda i: (0, 0))

    in_specs = [
        batch_spec(IN_PAD),
        resident_spec(w1p.shape), resident_spec(t1.shape),
        resident_spec(w2.shape), resident_spec(t2.shape),
        resident_spec(w3.shape), resident_spec(t3.shape),
        resident_spec(w4.shape), resident_spec(b4.shape),
    ]
    # Lane-dense output: (n_tiles, tb//128, 128) f32, one (1, tb//128, 128)
    # block per grid step; reshaped back to (B, 1) below.
    out_specs = pl.BlockSpec((1, tb // 128, 128), lambda i: (i, 0, 0))

    flops = 2 * Bp * (IN_DIM * H1 + H1 * H2 + H2 * H3 + H3)
    bytes_accessed = (Bp * IN_PAD * 2 + Bp * 4
                      + (IN_PAD * H1 + H1 * H2 + H2 * H3 + H3) * 2
                      + (H1 + H2 + H3 + 1) * 4)

    out = pl.pallas_call(
        sac_critic_kernel,
        out_shape=jax.ShapeDtypeStruct((n_tiles, tb // 128, 128), jnp.float32),
        grid_spec=pltpu.PrefetchScalarGridSpec(
            num_scalar_prefetch=0,
            grid=(n_tiles,),
            in_specs=in_specs,
            out_specs=out_specs,
        ),
        compiler_params=pltpu.CompilerParams(
            dimension_semantics=("parallel",),        # megacore on v7x
            vmem_limit_bytes=32 * 1024 * 1024,        # fits all generations
        ),
        cost_estimate=pl.CostEstimate(
            flops=flops, transcendentals=0, bytes_accessed=bytes_accessed),
    )(x, w1p, t1, w2, t2, w3, t3, w4, b4)

    return out.reshape(Bp, 1)[:B]


# ---------------------------------------------------------------------------
# Deterministic synthetic parameters (shapes follow the PyTorch __init__),
# with BN scale folded into the weights and weights cast to bf16.
# ---------------------------------------------------------------------------
def _init_linear(key, fan_in, fan_out):
    kw, kb = jax.random.split(key)
    bound = 1.0 / jnp.sqrt(fan_in)
    w = jax.random.uniform(kw, (fan_in, fan_out), jnp.float32, -bound, bound)
    b = jax.random.uniform(kb, (fan_out,), jnp.float32, -bound, bound)
    return w, b


def _init_bn(key, n):
    kg, kb, km, kv = jax.random.split(key, 4)
    gamma = jax.random.uniform(kg, (n,), jnp.float32, 0.5, 1.5)
    beta = 0.1 * jax.random.normal(kb, (n,), jnp.float32)
    mean = 0.1 * jax.random.normal(km, (n,), jnp.float32)
    var = jax.random.uniform(kv, (n,), jnp.float32, 0.5, 1.5)
    return gamma, beta, mean, var


def make_params(key):
    dims = [(IN_DIM, H1), (H1, H2), (H2, H3)]
    keys = jax.random.split(key, 7)
    params = []
    for i, (fi, fo) in enumerate(dims):
        w, b = _init_linear(keys[2 * i], fi, fo)
        gamma, beta, mean, var = _init_bn(keys[2 * i + 1], fo)
        scale = gamma / jnp.sqrt(var + BN_EPS)
        w_folded = (w * scale[None, :]).astype(jnp.bfloat16)        # (fi, fo) bf16
        shift = ((b - mean) * scale + beta)[None, :]                # (1, fo) f32
        params += [w_folded, shift.astype(jnp.float32)]
    w4, b4 = _init_linear(keys[6], H3, 1)
    params += [w4.T.astype(jnp.bfloat16),                           # (1, H3) bf16
               b4[None, :].astype(jnp.float32)]                     # (1, 1)  f32
    return tuple(params)


def reference_forward(state, action_one_hot, params):
    """Same math (bf16 matmul inputs, f32 accumulation) in plain XLA."""
    (w1, t1, w2, t2, w3, t3, w4, b4) = params
    x = jnp.concatenate([state.astype(jnp.float32),
                         action_one_hot.astype(jnp.float32)], axis=1)
    x = x.astype(jnp.bfloat16)
    h = jnp.maximum(jnp.dot(x, w1, preferred_element_type=jnp.float32) + t1, 0.0)
    h = jnp.maximum(jnp.dot(h.astype(jnp.bfloat16), w2,
                            preferred_element_type=jnp.float32) + t2, 0.0)
    h = jnp.maximum(jnp.dot(h.astype(jnp.bfloat16), w3,
                            preferred_element_type=jnp.float32) + t3, 0.0)
    return jnp.sum(h * w4.astype(jnp.float32), axis=-1, keepdims=True) + b4


if __name__ == "__main__":
    key = jax.random.PRNGKey(0)
    kp, ks, ka = jax.random.split(key, 3)

    B = 8
    params = make_params(kp)

    state = jax.random.normal(ks, (B, STATE_SIZE), jnp.float32)
    # integer one-hot actions, cast to float like `action_one_hot.float()`
    act_idx = jax.random.randint(ka, (B,), 0, ACTION_SIZE)
    action_one_hot = jax.nn.one_hot(act_idx, ACTION_SIZE, dtype=jnp.int32)

    out = sac_critic_forward(state, action_one_hot, params)
    out = jax.block_until_ready(out)

    ref = reference_forward(state, action_one_hot, params)
    assert out.shape == (B, 1), out.shape
    assert jnp.allclose(out, ref, atol=2e-2, rtol=2e-2), "mismatch vs reference"

    print("KERNEL_OK")
</pallas_src>

<mosaic_0001>
module attributes {stable_mosaic.version = 11 : i64} {
  func.func @sac_critic_kernel(%arg0: i32, %arg1: memref<128x128xbf16, #tpu.memory_space<vmem>>, %arg2: memref<128x512xbf16, #tpu.memory_space<vmem>>, %arg3: memref<1x512xf32, #tpu.memory_space<vmem>>, %arg4: memref<512x256xbf16, #tpu.memory_space<vmem>>, %arg5: memref<1x256xf32, #tpu.memory_space<vmem>>, %arg6: memref<256x128xbf16, #tpu.memory_space<vmem>>, %arg7: memref<1x128xf32, #tpu.memory_space<vmem>>, %arg8: memref<1x128xbf16, #tpu.memory_space<vmem>>, %arg9: memref<1x1xf32, #tpu.memory_space<vmem>>, %arg10: memref<1x1x128xf32, #tpu.memory_space<vmem>>) attributes {dimension_semantics = [#tpu.dimension_semantics<parallel>], iteration_bounds = array<i64: 1>, scalar_prefetch = 0 : i64, scratch_operands = 0 : i64, tpu.core_type = #tpu.core_type<tc>, window_params = [{transform_indices = @transform_0, window_bounds = array<i64: 128, 128>}, {pipeline_mode = #tpu.pipeline_mode<synchronous>, transform_indices = @transform_1, window_bounds = array<i64: 128, 512>}, {pipeline_mode = #tpu.pipeline_mode<synchronous>, transform_indices = @transform_2, window_bounds = array<i64: 1, 512>}, {pipeline_mode = #tpu.pipeline_mode<synchronous>, transform_indices = @transform_3, window_bounds = array<i64: 512, 256>}, {pipeline_mode = #tpu.pipeline_mode<synchronous>, transform_indices = @transform_4, window_bounds = array<i64: 1, 256>}, {pipeline_mode = #tpu.pipeline_mode<synchronous>, transform_indices = @transform_5, window_bounds = array<i64: 256, 128>}, {pipeline_mode = #tpu.pipeline_mode<synchronous>, transform_indices = @transform_6, window_bounds = array<i64: 1, 128>}, {pipeline_mode = #tpu.pipeline_mode<synchronous>, transform_indices = @transform_7, window_bounds = array<i64: 1, 128>}, {pipeline_mode = #tpu.pipeline_mode<synchronous>, transform_indices = @transform_8, window_bounds = array<i64: 1, 1>}, {transform_indices = @transform_9, window_bounds = array<i64: 1, 1, 128>}]} {
    %c0 = arith.constant 0 : index
    %c0_0 = arith.constant 0 : index
    %0 = vector.load %arg1[%c0, %c0_0] : memref<128x128xbf16, #tpu.memory_space<vmem>>, vector<128x128xbf16>
    %c0_1 = arith.constant 0 : index
    %c0_2 = arith.constant 0 : index
    %1 = vector.load %arg2[%c0_1, %c0_2] : memref<128x512xbf16, #tpu.memory_space<vmem>>, vector<128x512xbf16>
    %cst = arith.constant dense<0.000000e+00> : vector<128x512xf32>
    %2 = tpu.matmul %0, %1, %cst {dimension_numbers = #tpu.dot_dimension_numbers<[1], [0], [0], [1], [0, 0, 1, 1], [], []>} : vector<128x128xbf16>, vector<128x512xbf16>, vector<128x512xf32> -> vector<128x512xf32>
    %c0_3 = arith.constant 0 : index
    %c0_4 = arith.constant 0 : index
    %3 = vector.load %arg3[%c0_3, %c0_4] : memref<1x512xf32, #tpu.memory_space<vmem>>, vector<1x512xf32>
    %4 = vector.broadcast %3 : vector<1x512xf32> to vector<128x512xf32>
    %5 = arith.addf %2, %4 : vector<128x512xf32>
    %cst_5 = arith.constant 0.000000e+00 : f32
    %6 = vector.broadcast %cst_5 : f32 to vector<128x512xf32>
    %7 = arith.maximumf %5, %6 : vector<128x512xf32>
    %8 = arith.truncf %7 : vector<128x512xf32> to vector<128x512xbf16>
    %c0_6 = arith.constant 0 : index
    %c0_7 = arith.constant 0 : index
    %9 = vector.load %arg4[%c0_6, %c0_7] : memref<512x256xbf16, #tpu.memory_space<vmem>>, vector<512x256xbf16>
    %cst_8 = arith.constant dense<0.000000e+00> : vector<128x256xf32>
    %10 = tpu.matmul %8, %9, %cst_8 {dimension_numbers = #tpu.dot_dimension_numbers<[1], [0], [0], [1], [0, 0, 1, 1], [], []>} : vector<128x512xbf16>, vector<512x256xbf16>, vector<128x256xf32> -> vector<128x256xf32>
    %c0_9 = arith.constant 0 : index
    %c0_10 = arith.constant 0 : index
    %11 = vector.load %arg5[%c0_9, %c0_10] : memref<1x256xf32, #tpu.memory_space<vmem>>, vector<1x256xf32>
    %12 = vector.broadcast %11 : vector<1x256xf32> to vector<128x256xf32>
    %13 = arith.addf %10, %12 : vector<128x256xf32>
    %cst_11 = arith.constant 0.000000e+00 : f32
    %14 = vector.broadcast %cst_11 : f32 to vector<128x256xf32>
    %15 = arith.maximumf %13, %14 : vector<128x256xf32>
    %16 = arith.truncf %15 : vector<128x256xf32> to vector<128x256xbf16>
    %c0_12 = arith.constant 0 : index
    %c0_13 = arith.constant 0 : index
    %17 = vector.load %arg6[%c0_12, %c0_13] : memref<256x128xbf16, #tpu.memory_space<vmem>>, vector<256x128xbf16>
    %cst_14 = arith.constant dense<0.000000e+00> : vector<128x128xf32>
    %18 = tpu.matmul %16, %17, %cst_14 {dimension_numbers = #tpu.dot_dimension_numbers<[1], [0], [0], [1], [0, 0, 1, 1], [], []>} : vector<128x256xbf16>, vector<256x128xbf16>, vector<128x128xf32> -> vector<128x128xf32>
    %c0_15 = arith.constant 0 : index
    %c0_16 = arith.constant 0 : index
    %19 = vector.load %arg7[%c0_15, %c0_16] : memref<1x128xf32, #tpu.memory_space<vmem>>, vector<1x128xf32>
    %20 = vector.broadcast %19 : vector<1x128xf32> to vector<128x128xf32>
    %21 = arith.addf %18, %20 : vector<128x128xf32>
    %cst_17 = arith.constant 0.000000e+00 : f32
    %22 = vector.broadcast %cst_17 : f32 to vector<128x128xf32>
    %23 = arith.maximumf %21, %22 : vector<128x128xf32>
    %c0_18 = arith.constant 0 : index
    %c0_19 = arith.constant 0 : index
    %24 = vector.load %arg8[%c0_18, %c0_19] : memref<1x128xbf16, #tpu.memory_space<vmem>>, vector<1x128xbf16>
    %25 = arith.extf %24 : vector<1x128xbf16> to vector<1x128xf32>
    %26 = vector.broadcast %25 : vector<1x128xf32> to vector<128x128xf32>
    %27 = arith.mulf %23, %26 : vector<128x128xf32>
    %cst_20 = arith.constant dense<0.000000e+00> : vector<128xf32>
    %28 = vector.multi_reduction <add>, %27, %cst_20 [1] : vector<128x128xf32> to vector<128xf32>
    %29 = vector.shape_cast %28 : vector<128xf32> to vector<128x1xf32>
    %c0_21 = arith.constant 0 : index
    %c0_22 = arith.constant 0 : index
    %30 = vector.load %arg9[%c0_21, %c0_22] : memref<1x1xf32, #tpu.memory_space<vmem>>, vector<1x1xf32>
    %31 = vector.broadcast %30 : vector<1x1xf32> to vector<128x1xf32>
    %32 = arith.addf %29, %31 : vector<128x1xf32>
    %33 = vector.shape_cast %32 : vector<128x1xf32> to vector<1x1x128xf32>
    %c0_23 = arith.constant 0 : index
    %c0_24 = arith.constant 0 : index
    %c0_25 = arith.constant 0 : index
    %34 = vector.load %arg10[%c0_23, %c0_24, %c0_25] : memref<1x1x128xf32, #tpu.memory_space<vmem>>, vector<1x1x128xf32>
    tpu.vector_store %arg10[%c0_23, %c0_24, %c0_25], %33 {strides = array<i32>} : memref<1x1x128xf32, #tpu.memory_space<vmem>>, vector<1x1x128xf32>,
    return
  }
  func.func @transform_0(%arg0: i32) -> (i32, i32) {
    %c0_i32 = arith.constant 0 : i32
    %c0_i32_0 = arith.constant 0 : i32
    return %arg0, %c0_i32 : i32, i32
  }
  func.func @transform_1(%arg0: i32) -> (i32, i32) {
    %c0_i32 = arith.constant 0 : i32
    %c0_i32_0 = arith.constant 0 : i32
    %c0_i32_1 = arith.constant 0 : i32
    return %c0_i32, %c0_i32_0 : i32, i32
  }
  func.func @transform_2(%arg0: i32) -> (i32, i32) {
    %c0_i32 = arith.constant 0 : i32
    %c0_i32_0 = arith.constant 0 : i32
    %c0_i32_1 = arith.constant 0 : i32
    return %c0_i32, %c0_i32_0 : i32, i32
  }
  func.func @transform_3(%arg0: i32) -> (i32, i32) {
    %c0_i32 = arith.constant 0 : i32
    %c0_i32_0 = arith.constant 0 : i32
    %c0_i32_1 = arith.constant 0 : i32
    return %c0_i32, %c0_i32_0 : i32, i32
  }
  func.func @transform_4(%arg0: i32) -> (i32, i32) {
    %c0_i32 = arith.constant 0 : i32
    %c0_i32_0 = arith.constant 0 : i32
    %c0_i32_1 = arith.constant 0 : i32
    return %c0_i32, %c0_i32_0 : i32, i32
  }
  func.func @transform_5(%arg0: i32) -> (i32, i32) {
    %c0_i32 = arith.constant 0 : i32
    %c0_i32_0 = arith.constant 0 : i32
    %c0_i32_1 = arith.constant 0 : i32
    return %c0_i32, %c0_i32_0 : i32, i32
  }
  func.func @transform_6(%arg0: i32) -> (i32, i32) {
    %c0_i32 = arith.constant 0 : i32
    %c0_i32_0 = arith.constant 0 : i32
    %c0_i32_1 = arith.constant 0 : i32
    return %c0_i32, %c0_i32_0 : i32, i32
  }
  func.func @transform_7(%arg0: i32) -> (i32, i32) {
    %c0_i32 = arith.constant 0 : i32
    %c0_i32_0 = arith.constant 0 : i32
    %c0_i32_1 = arith.constant 0 : i32
    return %c0_i32, %c0_i32_0 : i32, i32
  }
  func.func @transform_8(%arg0: i32) -> (i32, i32) {
    %c0_i32 = arith.constant 0 : i32
    %c0_i32_0 = arith.constant 0 : i32
    %c0_i32_1 = arith.constant 0 : i32
    return %c0_i32, %c0_i32_0 : i32, i32
  }
  func.func @transform_9(%arg0: i32) -> (i32, i32, i32) {
    %c0_i32 = arith.constant 0 : i32
    %c0_i32_0 = arith.constant 0 : i32
    %c0_i32_1 = arith.constant 0 : i32
    return %arg0, %c0_i32, %c0_i32_0 : i32, i32, i32
  }
}

</mosaic_0001>

<bundles_post_ra>
// kernel: tpu_custom_call.1
= control target key start
LH: loop header
LB: loop body
LE: loop exit
PB: predicated region body
PF: predicated region fallthrough
CT: control target
= control target key end

     0   :  { %s2996_s0 = inlined_call_operand.hbm [shape: bf16[128,128], index: 0, kind: input, shape index: {}]   ;;  %s2997_s1 = inlined_call_operand.hbm [shape: bf16[128,512], index: 1, kind: input, shape index: {}]   ;;  %s2998_s2 = inlined_call_operand.vmem [shape: f32[1,512], index: 2, kind: input, shape index: {}]   ;;  %s2999_s3 = inlined_call_operand.hbm [shape: bf16[512,256], index: 3, kind: input, shape index: {}]   ;;  %s3000_s4 = inlined_call_operand.vmem [shape: f32[1,256], index: 4, kind: input, shape index: {}]   ;;  %s3001_s5 = inlined_call_operand.hbm [shape: bf16[256,128], index: 5, kind: input, shape index: {}]   ;;  %s3002_s6 = inlined_call_operand.vmem [shape: f32[1,128], index: 6, kind: input, shape index: {}]   ;;  %s3003_s7 = inlined_call_operand.vmem [shape: bf16[1,128], index: 7, kind: input, shape index: {}]   ;;  %s3004_s8 = inlined_call_operand.<no memory space> [shape: f32[1,1], index: 8, kind: input, shape index: {}]   ;;  %s3005_s9 = inlined_call_operand.hbm [shape: f32[1,1,128], index: 9, kind: output, shape index: {}]  }
   0x1   :  { %v14_v0 = vstv %s3004_s8 }
   0x2   :  { %15 = vst [vmem:[#allocation2] sm:$0x1] %v14_v0 }
   0x3   :  { %16 = vsyncpa [#allocation4], 0 }
   0x4   :  { %17 = vsyncpa [#allocation7], 0 }
   0x5   :  { %18 = vsyncpa [#allocation10], 0 }
   0x6   :  { %19 = vsyncpa [#allocation5], 0  ;;  %s2462_s11 = smov [#allocation6]   ;;  %s2344_s15 = scalar_lea.hbm %s2997_s1, 4096 }
   0x7   :  { %s37_s12 = sshll.u32 %s2462_s11, 4  ;;  %p2345_p0 = scmp.ne.s32.totalorder %s2997_s1, %s2344_s15  ;;  %s38_s12 = int_to_ptr.vmem [resolvable:$true] %s37_s12 }
   0x8   :  { %p2348_p1 = scmp.lt.u32.totalorder %s2344_s15, %s2997_s1 }
   0xa   :  { %p2350_p2 = pnand %p2348_p1, %p2345_p0 }
   0xc   :  { %2353 = shalt.err (!%p2350_p2)
}
   0xd   :  { %s2354_s8 = scalar_lea.vmem %s38_s12, 4096  ;;  %p2359_p4 = scmp.lt.s32.totalorder %s38_s12, %s38_s12 }
   0xe   :  { %p2355_p3 = scmp.ne.s32.totalorder %s38_s12, %s2354_s8  ;;  %p2360_p5 = scmp.lt.s32.totalorder %s2354_s8, %s2354_s8 }
  0x10   :  { %p2361_p6 = por %p2360_p5, %p2359_p4 }
  0x12   :  { %p2362_p7 = pnand %p2361_p6, %p2355_p3 }
  0x14   :  { %2365 = shalt.err (!%p2362_p7)
}
  0x15   :  { %s2463_s20 = smov 256   ;;  %s2464_s21 = smov 16  }
  0x16   :  { %43 = dma.hbm_to_vmem [thread:$0]  %s2997_s1, 4096, %s38_s12, [#allocation7], %s2463_s20, %s2463_s20, %s2464_s21  }
  0x17   :  { %s2465_s24 = smov [#allocation3]   ;;  %s2366_s28 = scalar_lea.hbm %s2996_s0, 1024 }
  0x18   :  { %s25_s25 = sshll.u32 %s2465_s24, 4  ;;  %p2367_p8 = scmp.ne.s32.totalorder %s2996_s0, %s2366_s28  ;;  %s26_s25 = int_to_ptr.vmem [resolvable:$true] %s25_s25 }
  0x19   :  { %p2370_p9 = scmp.lt.u32.totalorder %s2366_s28, %s2996_s0 }
  0x1b   :  { %p2372_p10 = pnand %p2370_p9, %p2367_p8 }
  0x1d   :  { %2375 = shalt.err (!%p2372_p10)
}
  0x1e   :  { %s2376_s13 = scalar_lea.vmem %s26_s25, 1024  ;;  %p2381_p12 = scmp.lt.s32.totalorder %s26_s25, %s26_s25 }
  0x1f   :  { %p2377_p11 = scmp.ne.s32.totalorder %s26_s25, %s2376_s13  ;;  %p2382_p13 = scmp.lt.s32.totalorder %s2376_s13, %s2376_s13 }
  0x21   :  { %p2383_p0 = por %p2382_p13, %p2381_p12 }
  0x23   :  { %p2384_p1 = pnand %p2383_p0, %p2377_p11 }
  0x25   :  { %2387 = shalt.err (!%p2384_p1)
}
  0x26   :  { %s2466_s1 = smov 64   ;;  %s2467_s12 = smov 4  }
  0x27   :  { %31 = dma.hbm_to_vmem [thread:$0]  %s2996_s0, 1024, %s26_s25, [#allocation4], %s2466_s1, %s2466_s1, %s2467_s12  }
  0x28   :  { %s2468_s16 = smov [#allocation8]   ;;  %s2388_s8 = scalar_lea.hbm %s2999_s3, 8192 }
  0x29   :  { %s51_s17 = sshll.u32 %s2468_s16, 4  ;;  %p2389_p2 = scmp.ne.s32.totalorder %s2999_s3, %s2388_s8  ;;  %s52_s17 = int_to_ptr.vmem [resolvable:$true] %s51_s17 }
  0x2a   :  { %p2392_p3 = scmp.lt.u32.totalorder %s2388_s8, %s2999_s3 }
  0x2c   :  { %p2394_p4 = pnand %p2392_p3, %p2389_p2 }
  0x2e   :  { %2397 = shalt.err (!%p2394_p4)
}
  0x2f   :  { %s2398_s24 = scalar_lea.vmem %s52_s17, 8192  ;;  %p2403_p6 = scmp.lt.s32.totalorder %s52_s17, %s52_s17 }
  0x30   :  { %p2399_p5 = scmp.ne.s32.totalorder %s52_s17, %s2398_s24  ;;  %p2404_p7 = scmp.lt.s32.totalorder %s2398_s24, %s2398_s24 }
  0x32   :  { %p2405_p8 = por %p2404_p7, %p2403_p6 }
  0x34   :  { %p2406_p9 = pnand %p2405_p8, %p2399_p5 }
  0x36   :  { %2409 = shalt.err (!%p2406_p9)
}
  0x37   :  { %s2469_s0 = smov 128   ;;  %s2470_s25 = smov 8  }
  0x38   :  { %57 = dma.hbm_to_vmem [thread:$0]  %s2999_s3, 8192, %s52_s17, [#allocation7], %s2469_s0, %s2469_s0, %s2470_s25  }
  0x39   :  { %s2471_s28 = smov [#allocation9]   ;;  %s2410_s11 = scalar_lea.hbm %s3001_s5, 2048 }
  0x3a   :  { %s65_s29 = sshll.u32 %s2471_s28, 4  ;;  %p2411_p10 = scmp.ne.s32.totalorder %s3001_s5, %s2410_s11  ;;  %s66_s29 = int_to_ptr.vmem [resolvable:$true] %s65_s29 }
  0x3b   :  { %p2414_p11 = scmp.lt.u32.totalorder %s2410_s11, %s3001_s5 }
  0x3d   :  { %p2416_p12 = pnand %p2414_p11, %p2411_p10 }
  0x3f   :  { %2419 = shalt.err (!%p2416_p12)
}
  0x40   :  { %s2420_s18 = scalar_lea.vmem %s66_s29, 2048  ;;  %p2425_p0 = scmp.lt.s32.totalorder %s66_s29, %s66_s29 }
  0x41   :  { %p2421_p13 = scmp.ne.s32.totalorder %s66_s29, %s2420_s18  ;;  %p2426_p1 = scmp.lt.s32.totalorder %s2420_s18, %s2420_s18 }
  0x43   :  { %p2427_p2 = por %p2426_p1, %p2425_p0 }
  0x45   :  { %p2428_p3 = pnand %p2427_p2, %p2421_p13 }
  0x47   :  { %2431 = shalt.err (!%p2428_p3)
}
  0x48   :  { %71 = dma.hbm_to_vmem [thread:$0]  %s3001_s5, 2048, %s66_s29, [#allocation10], %s2466_s1, %s2466_s1, %s2467_s12  }
  0x49   :  { %2454 = dma.done.wait [#allocation4], 1024  }
  0x4a   :  { %2455 = vsyncadd [#allocation4], 4294966272 }
  0x4b   :  { %2456 = dma.done.wait [#allocation7], 12288  }
  0x4c   :  { %2457 = vsyncadd [#allocation7], 4294955008 }
  0x4d   :  { %2458 = dma.done.wait [#allocation10], 2048  }
  0x4e   :  { %2459 = vsyncadd [#allocation10], 4294965248  ;;  %v2472_v1 = vmov 0   ;;  %v2176_v2 = vld [vmem:[#allocation6 + $0x4] ss:$16 sps:$4 sm:$0xff]   ;;  %v2225_v40 = vld [vmem:[#allocation3 + $0x8] sm:$0xff]  }
  0x4f   :  { %401 = vmatprep.mubr.bf16.mxu0 %v2472_v1  ;;  %514 = vmatprep.mubr.bf16.mxu1 %v2472_v1  ;;  %v2178_v3 = vld [vmem:[#allocation6] ss:$16 sps:$4 sm:$0xff]   ;;  %v2179_v4 = vld [vmem:[#allocation6 + $0xc] ss:$16 sps:$4 sm:$0xff]   ;;  %v2181_v5 = vld [vmem:[#allocation6 + $0x8] ss:$16 sps:$4 sm:$0xff]  }
  0x50   :  { %2174 = vset.pattern.permute.xlu0 %v2472_v1  ;;  %2175 = vset.pattern.permute.xlu1 %v2472_v1  ;;  %v2182_v6 = vld [vmem:[#allocation6 + $0x24] ss:$16 sps:$4 sm:$0xff]   ;;  %v2184_v7 = vld [vmem:[#allocation6 + $0x20] ss:$16 sps:$4 sm:$0xff]   ;;  %v2185_v8 = vld [vmem:[#allocation6 + $0x2c] ss:$16 sps:$4 sm:$0xff]  }
  0x51   :  { %369 = vmatprep.subr.bf16.mxu0 %v2176_v2  ;;  %482 = vmatprep.subr.bf16.mxu1 %v2179_v4  ;;  %v2187_v9 = vld [vmem:[#allocation6 + $0x28] ss:$16 sps:$4 sm:$0xff]   ;;  %v2188_v10 = vld [vmem:[#allocation6 + $0x44] ss:$16 sps:$4 sm:$0xff]   ;;  %v2190_v11 = vld [vmem:[#allocation6 + $0x40] ss:$16 sps:$4 sm:$0xff]  }
  0x52   :  { %370 = vmatpush1.bf16.msra.mxu0 %v2178_v3  ;;  %483 = vmatpush1.bf16.msra.mxu1 %v2181_v5  ;;  %v2191_v12 = vld [vmem:[#allocation6 + $0x4c] ss:$16 sps:$4 sm:$0xff]   ;;  %v2194_v13 = vld [vmem:[#allocation6 + $0x64] ss:$16 sps:$4 sm:$0xff]   ;;  %v2193_v14 = vld [vmem:[#allocation6 + $0x48] ss:$16 sps:$4 sm:$0xff]  }
  0x53   :  { %371 = vmatprep.subr.bf16.mxu0 %v2182_v6  ;;  %484 = vmatprep.subr.bf16.mxu1 %v2185_v8  ;;  %v2197_v15 = vld [vmem:[#allocation6 + $0x6c] ss:$16 sps:$4 sm:$0xff]   ;;  %v2196_v16 = vld [vmem:[#allocation6 + $0x60] ss:$16 sps:$4 sm:$0xff]   ;;  %v2200_v17 = vld [vmem:[#allocation6 + $0x84] ss:$16 sps:$4 sm:$0xff]  }
  0x54   :  { %v2199_v18 = vld [vmem:[#allocation6 + $0x68] ss:$16 sps:$4 sm:$0xff]   ;;  %v2203_v19 = vld [vmem:[#allocation6 + $0x8c] ss:$16 sps:$4 sm:$0xff]   ;;  %v2202_v20 = vld [vmem:[#allocation6 + $0x80] ss:$16 sps:$4 sm:$0xff]  }
  0x55   :  { %v2206_v21 = vld [vmem:[#allocation6 + $0xa4] ss:$16 sps:$4 sm:$0xff]   ;;  %v2205_v22 = vld [vmem:[#allocation6 + $0x88] ss:$16 sps:$4 sm:$0xff]   ;;  %v2209_v23 = vld [vmem:[#allocation6 + $0xac] ss:$16 sps:$4 sm:$0xff]  }
  0x56   :  { %372 = vmatpush1.bf16.msra.mxu0 %v2184_v7  ;;  %485 = vmatpush1.bf16.msra.mxu1 %v2187_v9  ;;  %v2208_v24 = vld [vmem:[#allocation6 + $0xa0] ss:$16 sps:$4 sm:$0xff]   ;;  %v2212_v25 = vld [vmem:[#allocation6 + $0xc4] ss:$16 sps:$4 sm:$0xff]   ;;  %v2211_v26 = vld [vmem:[#allocation6 + $0xa8] ss:$16 sps:$4 sm:$0xff]  }
  0x57   :  { %373 = vmatprep.subr.bf16.mxu0 %v2188_v10  ;;  %486 = vmatprep.subr.bf16.mxu1 %v2191_v12  ;;  %v2215_v27 = vld [vmem:[#allocation6 + $0xcc] ss:$16 sps:$4 sm:$0xff]   ;;  %v2214_v28 = vld [vmem:[#allocation6 + $0xc0] ss:$16 sps:$4 sm:$0xff]   ;;  %v2218_v29 = vld [vmem:[#allocation6 + $0xe4] ss:$16 sps:$4 sm:$0xff]  }
  0x58   :  { %v2217_v30 = vld [vmem:[#allocation6 + $0xc8] ss:$16 sps:$4 sm:$0xff]   ;;  %v2221_v31 = vld [vmem:[#allocation6 + $0xec] ss:$16 sps:$4 sm:$0xff]   ;;  %v2220_v32 = vld [vmem:[#allocation6 + $0xe0] ss:$16 sps:$4 sm:$0xff]  }
  0x59   :  { %v2223_v33 = vld [vmem:[#allocation6 + $0xe8] ss:$16 sps:$4 sm:$0xff]   ;;  %v2224_v34 = vld [vmem:[#allocation3] sm:$0xff]   ;;  %v2237_v37 = vld [vmem:[#allocation8 + $0x14] ss:$8 sps:$4 sm:$0xff]   ;;  %vm1761_vm0 = vcmask 130112  }
  0x5a   :  { %374 = vmatpush1.bf16.msra.mxu0 %v2190_v11  ;;  %487 = vmatpush1.bf16.msra.mxu1 %v2193_v14  ;;  %v2234_v35 = vld [vmem:[#allocation8 + $0x4] ss:$8 sps:$4 sm:$0xff]   ;;  %v2232_v36 = vld [vmem:[#allocation8] ss:$8 sps:$4 sm:$0xff]   ;;  %v2235_v38 = vld [vmem:[#allocation8 + $0x10] ss:$8 sps:$4 sm:$0xff]  }
  0x5b   :  { %375 = vmatprep.subr.bf16.mxu0 %v2194_v13  ;;  %488 = vmatprep.subr.bf16.mxu1 %v2197_v15  ;;  %v2240_v39 = vld [vmem:[#allocation8 + $0x24] ss:$8 sps:$4 sm:$0xff]   ;;  %v2238_v41 = vld [vmem:[#allocation8 + $0x20] ss:$8 sps:$4 sm:$0xff]   ;;  %v2243_v42 = vld [vmem:[#allocation8 + $0x34] ss:$8 sps:$4 sm:$0xff]  }
  0x5c   :  { %v2587_v43 = vld [vmem:[#allocation8 + $0x100] ss:$8 sps:$4 sm:$0xff]   ;;  %v2589_v44 = vld [vmem:[#allocation8 + $0x104] ss:$8 sps:$4 sm:$0xff]   ;;  %v2241_v45 = vld [vmem:[#allocation8 + $0x30] ss:$8 sps:$4 sm:$0xff]  }
  0x5d   :  { %v2246_v46 = vld [vmem:[#allocation8 + $0x44] ss:$8 sps:$4 sm:$0xff]   ;;  %v2594_v47 = vld [vmem:[#allocation8 + $0x114] ss:$8 sps:$4 sm:$0xff]   ;;  %v2597_v49 = vld [vmem:[#allocation8 + $0x110] ss:$8 sps:$4 sm:$0xff]  }
  0x5e   :  { %376 = vmatpush1.bf16.msra.mxu0 %v2196_v16  ;;  %489 = vmatpush1.bf16.msra.mxu1 %v2199_v18  ;;  %v2226_v48 = vld [vmem:[#allocation3 + $0x10] sm:$0xff]   ;;  %v2244_v50 = vld [vmem:[#allocation8 + $0x40] ss:$8 sps:$4 sm:$0xff]   ;;  %v2600_v52 = vld [vmem:[#allocation8 + $0x124] ss:$8 sps:$4 sm:$0xff]   ;;  %vm1768_vm1 = vcmask 195712  }
  0x5f   :  { %377 = vmatprep.subr.bf16.mxu0 %v2200_v17  ;;  %490 = vmatprep.subr.bf16.mxu1 %v2203_v19  ;;  %v2249_v51 = vld [vmem:[#allocation8 + $0x54] ss:$8 sps:$4 sm:$0xff]   ;;  %v2603_v53 = vld [vmem:[#allocation8 + $0x120] ss:$8 sps:$4 sm:$0xff]   ;;  %v2247_v54 = vld [vmem:[#allocation8 + $0x50] ss:$8 sps:$4 sm:$0xff]  }
  0x60   :  { %v2606_v55 = vld [vmem:[#allocation8 + $0x134] ss:$8 sps:$4 sm:$0xff]   ;;  %v2252_v56 = vld [vmem:[#allocation8 + $0x64] ss:$8 sps:$4 sm:$0xff]   ;;  %v2250_v58 = vld [vmem:[#allocation8 + $0x60] ss:$8 sps:$4 sm:$0xff]  }
  0x61   :  { %v2227_v57 = vld [vmem:[#allocation3 + $0x18] sm:$0xff]   ;;  %v2614_v61 = vld [vmem:[#allocation8 + $0x144] ss:$8 sps:$4 sm:$0xff]   ;;  %v2616_v62 = vld [vmem:[#allocation8 + $0x140] ss:$8 sps:$4 sm:$0xff]   ;;  %vm1775_vm2 = vcmask 261312  }
  0x62   :  { %378 = vmatpush1.bf16.msra.mxu0 %v2202_v20  ;;  %491 = vmatpush1.bf16.msra.mxu1 %v2205_v22  ;;  %v2255_v59 = vld [vmem:[#allocation8 + $0x74] ss:$8 sps:$4 sm:$0xff]   ;;  %v2611_v60 = vld [vmem:[#allocation8 + $0x130] ss:$8 sps:$4 sm:$0xff]   ;;  %v2258_v0 = vld [vmem:[#allocation8 + $0x84] ss:$8 sps:$4 sm:$0xff]  }
  0x63   :  { %379 = vmatprep.subr.bf16.mxu0 %v2206_v21  ;;  %492 = vmatprep.subr.bf16.mxu1 %v2209_v23  ;;  %v2253_v63 = vld [vmem:[#allocation8 + $0x70] ss:$8 sps:$4 sm:$0xff]   ;;  %v2228_v2 = vld [vmem:[#allocation3 + $0x20] sm:$0xff]   ;;  %v2264_v4 = vld [vmem:[#allocation8 + $0x94] ss:$8 sps:$4 sm:$0xff]   ;;  %vm1782_vm3 = vcmask 326912  }
  0x64   :  { %v2256_v3 = vld [vmem:[#allocation8 + $0x80] ss:$8 sps:$4 sm:$0xff]   ;;  %v2262_v5 = vld [vmem:[#allocation8 + $0x90] ss:$8 sps:$4 sm:$0xff]   ;;  %v2270_v6 = vld [vmem:[#allocation8 + $0xa4] ss:$8 sps:$4 sm:$0xff]  }
  0x65   :  { %v2229_v7 = vld [vmem:[#allocation3 + $0x28] sm:$0xff]   ;;  %v2276_v9 = vld [vmem:[#allocation8 + $0xb4] ss:$8 sps:$4 sm:$0xff]   ;;  %v2274_v10 = vld [vmem:[#allocation8 + $0xb0] ss:$8 sps:$4 sm:$0xff]   ;;  %vm1789_vm4 = vcmask 392512  }
  0x66   :  { %380 = vmatpush1.bf16.msra.mxu0 %v2208_v24  ;;  %493 = vmatpush1.bf16.msra.mxu1 %v2211_v26  ;;  %v2268_v8 = vld [vmem:[#allocation8 + $0xa0] ss:$8 sps:$4 sm:$0xff]   ;;  %v2282_v11 = vld [vmem:[#allocation8 + $0xc4] ss:$8 sps:$4 sm:$0xff]   ;;  %v2230_v12 = vld [vmem:[#allocation3 + $0x30] sm:$0xff]   ;;  %vm1796_vm5 = vcmask 458112  }
  0x67   :  { %381 = vmatprep.subr.bf16.mxu0 %v2212_v25  ;;  %494 = vmatprep.subr.bf16.mxu1 %v2215_v27  ;;  %v2280_v13 = vld [vmem:[#allocation8 + $0xc0] ss:$8 sps:$4 sm:$0xff]   ;;  %v2288_v14 = vld [vmem:[#allocation8 + $0xd4] ss:$8 sps:$4 sm:$0xff]   ;;  %v2286_v15 = vld [vmem:[#allocation8 + $0xd0] ss:$8 sps:$4 sm:$0xff]  }
  0x68   :  { %v2231_v16 = vld [vmem:[#allocation3 + $0x38] sm:$0xff]   ;;  %v2294_v19 = vld [vmem:[#allocation8 + $0xe4] ss:$8 sps:$4 sm:$0xff]   ;;  %v2292_v20 = vld [vmem:[#allocation8 + $0xe0] ss:$8 sps:$4 sm:$0xff]   ;;  %vm1803_vm6 = vcmask 523712  }
  0x69   :  { %v2629_v17 = vld [vmem:[#allocation8 + $0x154] ss:$8 sps:$4 sm:$0xff]   ;;  %v2631_v18 = vld [vmem:[#allocation8 + $0x150] ss:$8 sps:$4 sm:$0xff]   ;;  %v2635_v21 = vld [vmem:[#allocation8 + $0x164] ss:$8 sps:$4 sm:$0xff]  }
  0x6a   :  { %382 = vmatpush1.bf16.msra.mxu0 %v2214_v28  ;;  %495 = vmatpush1.bf16.msra.mxu1 %v2217_v30  ;;  %v2637_v22 = vld [vmem:[#allocation8 + $0x160] ss:$8 sps:$4 sm:$0xff]   ;;  %v2298_v23 = vld [vmem:[#allocation8 + $0xf0] ss:$8 sps:$4 sm:$0xff]   ;;  %v2641_v24 = vld [vmem:[#allocation8 + $0x174] ss:$8 sps:$4 sm:$0xff]  }
  0x6b   :  { %383 = vmatprep.subr.bf16.mxu0 %v2218_v29  ;;  %496 = vmatprep.subr.bf16.mxu1 %v2221_v31  ;;  %v2643_v25 = vld [vmem:[#allocation8 + $0x170] ss:$8 sps:$4 sm:$0xff]   ;;  %v2648_v26 = vld [vmem:[#allocation8 + $0x184] ss:$8 sps:$4 sm:$0xff]   ;;  %v2650_v27 = vld [vmem:[#allocation8 + $0x180] ss:$8 sps:$4 sm:$0xff]  }
  0x6c   :  { %v2654_v28 = vld [vmem:[#allocation8 + $0x194] ss:$8 sps:$4 sm:$0xff]   ;;  %v2656_v29 = vld [vmem:[#allocation8 + $0x190] ss:$8 sps:$4 sm:$0xff]   ;;  %v2660_v30 = vld [vmem:[#allocation8 + $0x1a4] ss:$8 sps:$4 sm:$0xff]  }
  0x6d   :  { %v2662_v31 = vld [vmem:[#allocation8 + $0x1a0] ss:$8 sps:$4 sm:$0xff]   ;;  %vm1810_vm7 = vcmask 589312   ;;  %vm1817_vm8 = vcmask 654912   ;;  %vm1824_vm9 = vcmask 720512   ;;  %vm1831_vm10 = vcmask 786112  }
  0x6e   :  { %384 = vmatpush1.bf16.msra.mxu0 %v2220_v32  ;;  %497 = vmatpush1.bf16.msra.mxu1 %v2223_v33  ;;  %v2666_v32 = vld [vmem:[#allocation8 + $0x1b4] ss:$8 sps:$4 sm:$0xff]   ;;  %v2668_v33 = vld [vmem:[#allocation8 + $0x1b0] ss:$8 sps:$4 sm:$0xff]   ;;  %vm1838_vm11 = vcmask 851712   ;;  %vm1845_vm12 = vcmask 917312  }
  0x6f   :  { %1087 = vmatprep.subr.bf16.mxu0 %v2234_v35  ;;  %2066 = vmatprep.subr.bf16.mxu1 %v2589_v44  ;;  %v2674_v35 = vld [vmem:[#allocation8 + $0x1c0] ss:$8 sps:$4 sm:$0xff]   ;;  %vm1852_vm13 = vcmask 982912   ;;  %vm1859_vm14 = vcmask 1048512  }
  0x71   :  { %402 = vmatmul.mubr.bf16.vlgmr.msra.gmra.mrb[0].mxu0 %v2224_v34  ;;  %515 = vmatmul.mubr.bf16.vlgmr.msra.gmra.mrb[0].mxu1 %v2224_v34  ;;  %v2672_v34 = vld [vmem:[#allocation8 + $0x1c4] ss:$8 sps:$4 sm:$0xff]  }
  0x72   :  { %411 = vmatprep.mubr.bf16.mxu0 %v2472_v1  ;;  %1088 = vmatpush1.bf16.msra.mxu0 %v2232_v36  ;;  %v2678_v36 = vld [vmem:[#allocation8 + $0x1d4] ss:$8 sps:$4 sm:$0xff]  }
  0x73   :  { %1089 = vmatprep.subr.bf16.mxu0 %v2237_v37  ;;  %524 = vmatprep.mubr.bf16.mxu1 %v2472_v1  ;;  %v2680_v37 = vld [vmem:[#allocation8 + $0x1d0] ss:$8 sps:$4 sm:$0xff]  }
  0x74   :  { %2082 = vmatpush1.bf16.msra.mxu1 %v2587_v43 }
  0x75   :  { %2067 = vmatprep.subr.bf16.mxu1 %v2594_v47 }
  0x76   :  { %1090 = vmatpush1.bf16.msra.mxu0 %v2235_v38  ;;  %v2684_v38 = vld [vmem:[#allocation8 + $0x1e4] ss:$8 sps:$4 sm:$0xff]  }
  0x77   :  { %1091 = vmatprep.subr.bf16.mxu0 %v2240_v39  ;;  %v2686_v39 = vld [vmem:[#allocation8 + $0x1e0] ss:$8 sps:$4 sm:$0xff]  }
  0x78   :  { %2083 = vmatpush1.bf16.msra.mxu1 %v2597_v49 }
  0x79   :  { %412 = vmatmul.mubr.bf16.gmra.mrb[4].mxu0 %v2225_v40  ;;  %525 = vmatmul.mubr.bf16.gmra.mrb[4].mxu1 %v2225_v40  ;;  %v2690_v40 = vld [vmem:[#allocation8 + $0x1f4] ss:$8 sps:$4 sm:$0xff]  }
  0x7a   :  { %421 = vmatprep.mubr.bf16.mxu0 %v2472_v1  ;;  %1092 = vmatpush1.bf16.msra.mxu0 %v2238_v41  ;;  %v2692_v41 = vld [vmem:[#allocation8 + $0x1f0] ss:$8 sps:$4 sm:$0xff]  }
  0x7b   :  { %1093 = vmatprep.subr.bf16.mxu0 %v2243_v42  ;;  %534 = vmatprep.mubr.bf16.mxu1 %v2472_v1  ;;  %v141_v42 = vlaneseq }
  0x7c   :  { %2068 = vmatprep.subr.bf16.mxu1 %v2600_v52 }
  0x7d   :  { %2084 = vmatpush1.bf16.msra.mxu1 %v2603_v53 }
  0x7e   :  { %1094 = vmatpush1.bf16.msra.mxu0 %v2241_v45  ;;  %2069 = vmatprep.subr.bf16.mxu1 %v2606_v55 }
  0x7f   :  { %1095 = vmatprep.subr.bf16.mxu0 %v2246_v46  ;;  %v139_v46 = vld [vmem:[%s2998_s2] sm:$0xf] }
  0x81   :  { %422 = vmatmul.mubr.bf16.gmra.mrb[8].mxu0 %v2226_v48  ;;  %535 = vmatmul.mubr.bf16.gmra.mrb[8].mxu1 %v2226_v48 }
  0x82   :  { %431 = vmatprep.mubr.bf16.mxu0 %v2472_v1  ;;  %1096 = vmatpush1.bf16.msra.mxu0 %v2244_v50 }
  0x83   :  { %1097 = vmatprep.subr.bf16.mxu0 %v2249_v51  ;;  %544 = vmatprep.mubr.bf16.mxu1 %v2472_v1 }
  0x84   :  { %2085 = vmatpush1.bf16.msra.mxu1 %v2611_v60 }
  0x85   :  { %2070 = vmatprep.subr.bf16.mxu1 %v2614_v61 }
  0x86   :  { %1098 = vmatpush1.bf16.msra.mxu0 %v2247_v54 }
  0x87   :  { %1099 = vmatprep.subr.bf16.mxu0 %v2252_v56 }
  0x88   :  { %2086 = vmatpush1.bf16.msra.mxu1 %v2616_v62 }
  0x89   :  { %432 = vmatmul.mubr.bf16.gmra.mrb[12].mxu0 %v2227_v57  ;;  %545 = vmatmul.mubr.bf16.gmra.mrb[12].mxu1 %v2227_v57 }
  0x8a   :  { %441 = vmatprep.mubr.bf16.mxu0 %v2472_v1  ;;  %1100 = vmatpush1.bf16.msra.mxu0 %v2250_v58 }
  0x8b   :  { %1101 = vmatprep.subr.bf16.mxu0 %v2255_v59  ;;  %554 = vmatprep.mubr.bf16.mxu1 %v2472_v1 }
  0x8c   :  { %2071 = vmatprep.subr.bf16.mxu1 %v2629_v17 }
  0x8d   :  { %2087 = vmatpush1.bf16.msra.mxu1 %v2631_v18 }
  0x8e   :  { %1102 = vmatpush1.bf16.msra.mxu0 %v2253_v63  ;;  %2072 = vmatprep.subr.bf16.mxu1 %v2635_v21 }
  0x8f   :  { %1103 = vmatprep.subr.bf16.mxu0 %v2258_v0 }
  0x91   :  { %442 = vmatmul.mubr.bf16.gmra.mrb[16].mxu0 %v2228_v2  ;;  %555 = vmatmul.mubr.bf16.gmra.mrb[16].mxu1 %v2228_v2 }
  0x92   :  { %451 = vmatprep.mubr.bf16.mxu0 %v2472_v1  ;;  %1104 = vmatpush1.bf16.msra.mxu0 %v2256_v3 }
  0x93   :  { %1105 = vmatprep.subr.bf16.mxu0 %v2264_v4  ;;  %564 = vmatprep.mubr.bf16.mxu1 %v2472_v1 }
  0x94   :  { %2088 = vmatpush1.bf16.msra.mxu1 %v2637_v22 }
  0x95   :  { %2073 = vmatprep.subr.bf16.mxu1 %v2641_v24 }
  0x96   :  { %1106 = vmatpush1.bf16.msra.mxu0 %v2262_v5 }
  0x97   :  { %1107 = vmatprep.subr.bf16.mxu0 %v2270_v6 }
  0x98   :  { %2089 = vmatpush1.bf16.msra.mxu1 %v2643_v25 }
  0x99   :  { %452 = vmatmul.mubr.bf16.gmra.mrb[20].mxu0 %v2229_v7  ;;  %565 = vmatmul.mubr.bf16.gmra.mrb[20].mxu1 %v2229_v7 }
  0x9a   :  { %461 = vmatprep.mubr.bf16.mxu0 %v2472_v1  ;;  %1108 = vmatpush1.bf16.msra.mxu0 %v2268_v8 }
  0x9b   :  { %1109 = vmatprep.subr.bf16.mxu0 %v2276_v9  ;;  %574 = vmatprep.mubr.bf16.mxu1 %v2472_v1 }
  0x9c   :  { %2074 = vmatprep.subr.bf16.mxu1 %v2648_v26 }
  0x9d   :  { %2090 = vmatpush1.bf16.msra.mxu1 %v2650_v27 }
  0x9e   :  { %1110 = vmatpush1.bf16.msra.mxu0 %v2274_v10  ;;  %2075 = vmatprep.subr.bf16.mxu1 %v2654_v28 }
  0x9f   :  { %1111 = vmatprep.subr.bf16.mxu0 %v2282_v11 }
  0xa1   :  { %462 = vmatmul.mubr.bf16.gmra.mrb[24].mxu0 %v2230_v12  ;;  %575 = vmatmul.mubr.bf16.gmra.mrb[24].mxu1 %v2230_v12 }
  0xa2   :  { %471 = vmatprep.mubr.bf16.mxu0 %v2472_v1  ;;  %1112 = vmatpush1.bf16.msra.mxu0 %v2280_v13 }
  0xa3   :  { %1113 = vmatprep.subr.bf16.mxu0 %v2288_v14  ;;  %584 = vmatprep.mubr.bf16.mxu1 %v2472_v1  ;;  %v2300_v1 = vld [vmem:[#allocation8 + $0xf4] ss:$8 sps:$4 sm:$0xff]  }
  0xa4   :  { %2091 = vmatpush1.bf16.msra.mxu1 %v2656_v29 }
  0xa5   :  { %2076 = vmatprep.subr.bf16.mxu1 %v2660_v30 }
  0xa6   :  { %1114 = vmatpush1.bf16.msra.mxu0 %v2286_v15 }
  0xa7   :  { %1115 = vmatprep.subr.bf16.mxu0 %v2294_v19 }
  0xa8   :  { %2092 = vmatpush1.bf16.msra.mxu1 %v2662_v31 }
  0xa9   :  { %472 = vmatmul.mubr.bf16.gmra.mrb[28].mxu0 %v2231_v16  ;;  %585 = vmatmul.mubr.bf16.gmra.mrb[28].mxu1 %v2231_v16 }
  0xaa   :  { %1116 = vmatpush1.bf16.msra.mxu0 %v2292_v20  ;;  %2077 = vmatprep.subr.bf16.mxu1 %v2666_v32 }
  0xab   :  { %1117 = vmatprep.subr.bf16.mxu0 %v2300_v1 }
  0xac   :  { %2093 = vmatpush1.bf16.msra.mxu1 %v2668_v33 }
  0xad   :  { %2078 = vmatprep.subr.bf16.mxu1 %v2672_v34 }
  0xae   :  { %1118 = vmatpush1.bf16.msra.mxu0 %v2298_v23 }
  0xaf   :  { %1200 = vmatprep.subr.bf16.mxu0 %v2589_v44  ;;  %v2697_v44 = vshrl.u32 %v141_v42, 7 }
  0xb0   :  { %2094 = vmatpush1.bf16.msra.mxu1 %v2674_v35 }
  0xb1   :  { %2079 = vmatprep.subr.bf16.mxu1 %v2678_v36  ;;  %v2700_v45 = vsub.s32 0, %v2697_v44  ;;  %v147_v48 = vsub.s32 1, %v2697_v44  ;;  %v151_v51 = vsub.s32 2, %v2697_v44  ;;  %v155_v56 = vsub.s32 3, %v2697_v44 }
  0xb3   :  { %v2707_v50 = vrot.slane %v139_v46, %v2700_v45  ;;  %v2712_v54 = vrot.slane %v139_v46, %v147_v48  ;;  %v2716_v63 = vrot.slane %v139_v46, %v151_v51  ;;  %v2719_v4 = vrot.slane %v139_v46, %v155_v56 }
  0xb4   :  { %2095 = vmatpush1.bf16.msra.mxu1 %v2680_v37 }
  0xb5   :  { %2080 = vmatprep.subr.bf16.mxu1 %v2684_v38 }
  0xb8   :  { %2096 = vmatpush1.bf16.msra.mxu1 %v2686_v39 }
  0xb9   :  { %2081 = vmatprep.subr.bf16.mxu1 %v2690_v40 }
  0xbc   :  { %2097 = vmatpush1.bf16.msra.mxu1 %v2692_v41 }
 0x144   :  { %v403_v57 = vpop.f32.mrb[0].mxu0  ;;  %v516_v3 = vpop.f32.mrb[0].mxu1 }
 0x145   :  { %v404_v58 = vadd.f32 %v403_v57, %v2707_v50  ;;  %v405_v59 = vpop.f32.mrb[1].mxu0  ;;  %v517_v7 = vadd.f32 %v516_v3, %v2716_v63  ;;  %v518_v8 = vpop.f32.mrb[1].mxu1 }
 0x146   :  { %v406_v0 = vadd.f32 %v405_v59, %v2712_v54  ;;  %v407_v2 = vpop.f32.mrb[2].mxu0  ;;  %v519_v10 = vadd.f32 %v518_v8, %v2719_v4  ;;  %v520_v11 = vpop.f32.mrb[2].mxu1 }
 0x147   :  { %v408_v5 = vadd.f32 %v407_v2, %v2707_v50  ;;  %v409_v6 = vpop.f32.mrb[3].mxu0  ;;  %v595_v12 = vmax.f32 %v404_v58, 0.0  ;;  %v597_v14 = vmax.f32 %v517_v7, 0.0  ;;  %v521_v15 = vadd.f32 %v520_v11, %v2716_v63  ;;  %v522_v16 = vpop.f32.mrb[3].mxu1 }
 0x148   :  { %v410_v9 = vadd.f32 %v409_v6, %v2712_v54  ;;  %v596_v19 = vmax.f32 %v406_v0, 0.0  ;;  %v598_v1 = vmax.f32 %v519_v10, 0.0  ;;  %v523_v23 = vadd.f32 %v522_v16, %v2719_v4 }
 0x149   :  { %v599_v13 = vmax.f32 %v408_v5, 0.0  ;;  %v601_v51 = vmax.f32 %v521_v15, 0.0 }
 0x14a   :  { %v600_v20 = vmax.f32 %v410_v9, 0.0  ;;  %v602_v59 = vmax.f32 %v523_v23, 0.0 }
 0x14b   :  { %v659_v46 = vpack.c.bf16 %v599_v13, %v595_v12  ;;  %v2728_v6 = vpack.c.bf16 %v601_v51, %v597_v14 }
 0x14c   :  { %v660_v56 = vpack.c.bf16 %v600_v20, %v596_v19  ;;  %v413_v57 = vpop.f32.mrb[4].mxu0  ;;  %v2731_v7 = vpack.c.bf16 %v602_v59, %v598_v1  ;;  %v526_v0 = vpop.f32.mrb[4].mxu1 }
 0x14d   :  { %v414_v2 = vadd.f32 %v413_v57, %v2707_v50  ;;  %v415_v3 = vpop.f32.mrb[5].mxu0  ;;  %v527_v10 = vadd.f32 %v526_v0, %v2716_v63  ;;  %v528_v11 = vpop.f32.mrb[5].mxu1 }
 0x14e   :  { %v416_v58 = vadd.f32 %v415_v3, %v2712_v54  ;;  %v417_v5 = vpop.f32.mrb[6].mxu0  ;;  %1119 = vmatprep.mubr.bf16.mxu0 %v660_v56  ;;  %v529_v13 = vadd.f32 %v528_v11, %v2719_v4  ;;  %v530_v14 = vpop.f32.mrb[6].mxu1 }
 0x14f   :  { %v418_v8 = vadd.f32 %v417_v5, %v2707_v50  ;;  %v419_v9 = vpop.f32.mrb[7].mxu0  ;;  %1120 = vmatmul.mubr.bf16.vlgmr.msra.gmra.mrb[32].mxu0 %v659_v46  ;;  %v603_v15 = vmax.f32 %v414_v2, 0.0  ;;  %v605_v19 = vmax.f32 %v527_v10, 0.0  ;;  %v531_v20 = vadd.f32 %v530_v14, %v2716_v63  ;;  %v532_v1 = vpop.f32.mrb[7].mxu1 }
 0x150   :  { %v420_v12 = vadd.f32 %v419_v9, %v2712_v54  ;;  %1201 = vmatpush1.bf16.msra.mxu0 %v2587_v43  ;;  %v604_v23 = vmax.f32 %v416_v58, 0.0  ;;  %v606_v51 = vmax.f32 %v529_v13, 0.0  ;;  %v533_v56 = vadd.f32 %v532_v1, %v2719_v4 }
 0x151   :  { %v607_v16 = vmax.f32 %v418_v8, 0.0  ;;  %1202 = vmatprep.subr.bf16.mxu0 %v2594_v47  ;;  %v609_v59 = vmax.f32 %v531_v20, 0.0 }
 0x152   :  { %v608_v46 = vmax.f32 %v420_v12, 0.0  ;;  %v610_v5 = vmax.f32 %v533_v56, 0.0 }
 0x153   :  { %v663_v57 = vpack.c.bf16 %v607_v16, %v603_v15  ;;  %v2744_v47 = vpack.c.bf16 %v609_v59, %v605_v19 }
 0x154   :  { %v664_v3 = vpack.c.bf16 %v608_v46, %v604_v23  ;;  %1203 = vmatpush1.bf16.msra.mxu0 %v2597_v49  ;;  %v423_v43 = vpop.f32.mrb[8].mxu0  ;;  %v2747_v9 = vpack.c.bf16 %v610_v5, %v606_v51  ;;  %v536_v10 = vpop.f32.mrb[8].mxu1 }
 0x155   :  { %v424_v2 = vadd.f32 %v423_v43, %v2707_v50  ;;  %v425_v0 = vpop.f32.mrb[9].mxu0  ;;  %1204 = vmatprep.subr.bf16.mxu0 %v2600_v52  ;;  %v537_v49 = vadd.f32 %v536_v10, %v2716_v63  ;;  %v538_v13 = vpop.f32.mrb[9].mxu1 }
 0x156   :  { %v426_v58 = vadd.f32 %v425_v0, %v2712_v54  ;;  %v427_v8 = vpop.f32.mrb[10].mxu0  ;;  %1129 = vmatprep.mubr.bf16.mxu0 %v664_v3  ;;  %v539_v52 = vadd.f32 %v538_v13, %v2719_v4  ;;  %v540_v15 = vpop.f32.mrb[10].mxu1 }
 0x157   :  { %v428_v11 = vadd.f32 %v427_v8, %v2707_v50  ;;  %v429_v12 = vpop.f32.mrb[11].mxu0  ;;  %1130 = vmatmul.mubr.bf16.gmra.mrb[36].mxu0 %v663_v57  ;;  %v611_v16 = vmax.f32 %v424_v2, 0.0  ;;  %v613_v20 = vmax.f32 %v537_v49, 0.0  ;;  %v541_v1 = vadd.f32 %v540_v15, %v2716_v63  ;;  %v542_v23 = vpop.f32.mrb[11].mxu1 }
 0x158   :  { %v430_v14 = vadd.f32 %v429_v12, %v2712_v54  ;;  %1205 = vmatpush1.bf16.msra.mxu0 %v2603_v53  ;;  %v612_v46 = vmax.f32 %v426_v58, 0.0  ;;  %v614_v56 = vmax.f32 %v539_v52, 0.0  ;;  %v543_v57 = vadd.f32 %v542_v23, %v2719_v4 }
 0x159   :  { %v615_v19 = vmax.f32 %v428_v11, 0.0  ;;  %1206 = vmatprep.subr.bf16.mxu0 %v2606_v55  ;;  %v617_v3 = vmax.f32 %v541_v1, 0.0 }
 0x15a   :  { %v616_v51 = vmax.f32 %v430_v14, 0.0  ;;  %v618_v5 = vmax.f32 %v543_v57, 0.0 }
 0x15b   :  { %v667_v59 = vpack.c.bf16 %v615_v19, %v611_v16  ;;  %v2760_v55 = vpack.c.bf16 %v617_v3, %v613_v20 }
 0x15c   :  { %v668_v43 = vpack.c.bf16 %v616_v51, %v612_v46  ;;  %1207 = vmatpush1.bf16.msra.mxu0 %v2611_v60  ;;  %v433_v53 = vpop.f32.mrb[12].mxu0  ;;  %v2763_v10 = vpack.c.bf16 %v618_v5, %v614_v56  ;;  %v546_v11 = vpop.f32.mrb[12].mxu1 }
 0x15d   :  { %v434_v2 = vadd.f32 %v433_v53, %v2707_v50  ;;  %v435_v0 = vpop.f32.mrb[13].mxu0  ;;  %1208 = vmatprep.subr.bf16.mxu0 %v2614_v61  ;;  %v547_v60 = vadd.f32 %v546_v11, %v2716_v63  ;;  %v548_v13 = vpop.f32.mrb[13].mxu1 }
 0x15e   :  { %v436_v58 = vadd.f32 %v435_v0, %v2712_v54  ;;  %v437_v8 = vpop.f32.mrb[14].mxu0  ;;  %1139 = vmatprep.mubr.bf16.mxu0 %v668_v43  ;;  %v549_v61 = vadd.f32 %v548_v13, %v2719_v4  ;;  %v550_v52 = vpop.f32.mrb[14].mxu1 }
 0x15f   :  { %v438_v12 = vadd.f32 %v437_v8, %v2707_v50  ;;  %v439_v49 = vpop.f32.mrb[15].mxu0  ;;  %1140 = vmatmul.mubr.bf16.gmra.mrb[40].mxu0 %v667_v59  ;;  %v619_v15 = vmax.f32 %v434_v2, 0.0  ;;  %v621_v19 = vmax.f32 %v547_v60, 0.0  ;;  %v551_v20 = vadd.f32 %v550_v52, %v2716_v63  ;;  %v552_v1 = vpop.f32.mrb[15].mxu1 }
 0x160   :  { %v440_v14 = vadd.f32 %v439_v49, %v2712_v54  ;;  %1209 = vmatpush1.bf16.msra.mxu0 %v2616_v62  ;;  %v620_v23 = vmax.f32 %v436_v58, 0.0  ;;  %v622_v51 = vmax.f32 %v549_v61, 0.0  ;;  %v553_v56 = vadd.f32 %v552_v1, %v2719_v4 }
 0x161   :  { %v623_v16 = vmax.f32 %v438_v12, 0.0  ;;  %1210 = vmatprep.subr.bf16.mxu0 %v2629_v17  ;;  %v625_v59 = vmax.f32 %v551_v20, 0.0 }
 0x162   :  { %v624_v46 = vmax.f32 %v440_v14, 0.0  ;;  %v626_v43 = vmax.f32 %v553_v56, 0.0 }
 0x163   :  { %v671_v57 = vpack.c.bf16 %v623_v16, %v619_v15  ;;  %v2775_v5 = vpack.c.bf16 %v625_v59, %v621_v19 }
 0x164   :  { %v672_v3 = vpack.c.bf16 %v624_v46, %v620_v23  ;;  %1211 = vmatpush1.bf16.msra.mxu0 %v2631_v18  ;;  %v443_v62 = vpop.f32.mrb[16].mxu0  ;;  %v2779_v0 = vpack.c.bf16 %v626_v43, %v622_v51  ;;  %v556_v8 = vpop.f32.mrb[16].mxu1 }
 0x165   :  { %v444_v53 = vadd.f32 %v443_v62, %v2707_v50  ;;  %v445_v17 = vpop.f32.mrb[17].mxu0  ;;  %1212 = vmatprep.subr.bf16.mxu0 %v2635_v21  ;;  %v557_v18 = vadd.f32 %v556_v8, %v2716_v63  ;;  %v558_v49 = vpop.f32.mrb[17].mxu1 }
 0x166   :  { %v446_v2 = vadd.f32 %v445_v17, %v2712_v54  ;;  %v447_v58 = vpop.f32.mrb[18].mxu0  ;;  %1149 = vmatprep.mubr.bf16.mxu0 %v672_v3  ;;  %v559_v13 = vadd.f32 %v558_v49, %v2719_v4  ;;  %v560_v21 = vpop.f32.mrb[18].mxu1 }
 0x167   :  { %v448_v11 = vadd.f32 %v447_v58, %v2707_v50  ;;  %v449_v12 = vpop.f32.mrb[19].mxu0  ;;  %1150 = vmatmul.mubr.bf16.gmra.mrb[44].mxu0 %v671_v57  ;;  %v627_v14 = vmax.f32 %v444_v53, 0.0  ;;  %v629_v52 = vmax.f32 %v557_v18, 0.0  ;;  %v561_v15 = vadd.f32 %v560_v21, %v2716_v63  ;;  %v562_v16 = vpop.f32.mrb[19].mxu1 }
 0x168   :  { %v450_v60 = vadd.f32 %v449_v12, %v2712_v54  ;;  %1213 = vmatpush1.bf16.msra.mxu0 %v2637_v22  ;;  %v628_v19 = vmax.f32 %v446_v2, 0.0  ;;  %v630_v1 = vmax.f32 %v559_v13, 0.0  ;;  %v563_v23 = vadd.f32 %v562_v16, %v2719_v4 }
 0x169   :  { %v631_v61 = vmax.f32 %v448_v11, 0.0  ;;  %1214 = vmatprep.subr.bf16.mxu0 %v2641_v24  ;;  %v633_v51 = vmax.f32 %v561_v15, 0.0 }
 0x16a   :  { %v632_v20 = vmax.f32 %v450_v60, 0.0  ;;  %v634_v57 = vmax.f32 %v563_v23, 0.0 }
 0x16b   :  { %v675_v46 = vpack.c.bf16 %v631_v61, %v627_v14  ;;  %v677_v59 = vpack.c.bf16 %v633_v51, %v629_v52 }
 0x16c   :  { %v676_v56 = vpack.c.bf16 %v632_v20, %v628_v19  ;;  %1215 = vmatpush1.bf16.msra.mxu0 %v2643_v25  ;;  %v453_v22 = vpop.f32.mrb[20].mxu0  ;;  %v678_v43 = vpack.c.bf16 %v634_v57, %v630_v1  ;;  %v566_v17 = vpop.f32.mrb[20].mxu1 }
 0x16d   :  { %v454_v3 = vadd.f32 %v453_v22, %v2707_v50  ;;  %v455_v62 = vpop.f32.mrb[21].mxu0  ;;  %1216 = vmatprep.subr.bf16.mxu0 %v2648_v26  ;;  %v567_v58 = vadd.f32 %v566_v17, %v2716_v63  ;;  %v568_v11 = vpop.f32.mrb[21].mxu1 }
 0x16e   :  { %v456_v24 = vadd.f32 %v455_v62, %v2712_v54  ;;  %v457_v53 = vpop.f32.mrb[22].mxu0  ;;  %1159 = vmatprep.mubr.bf16.mxu0 %v676_v56  ;;  %v569_v18 = vadd.f32 %v568_v11, %v2719_v4  ;;  %v570_v26 = vpop.f32.mrb[22].mxu1  ;;  %1272 = vmatprep.mubr.bf16.mxu1 %v678_v43 }
 0x16f   :  { %v458_v2 = vadd.f32 %v457_v53, %v2707_v50  ;;  %v459_v8 = vpop.f32.mrb[23].mxu0  ;;  %1160 = vmatmul.mubr.bf16.gmra.mrb[48].mxu0 %v675_v46  ;;  %v635_v12 = vmax.f32 %v454_v3, 0.0  ;;  %v637_v60 = vmax.f32 %v567_v58, 0.0  ;;  %v571_v13 = vadd.f32 %v570_v26, %v2716_v63  ;;  %v572_v21 = vpop.f32.mrb[23].mxu1  ;;  %1273 = vmatmul.mubr.bf16.vlgmr.msra.gmra.mrb[32].mxu1 %v677_v59 }
 0x170   :  { %v460_v25 = vadd.f32 %v459_v8, %v2712_v54  ;;  %1217 = vmatpush1.bf16.msra.mxu0 %v2650_v27  ;;  %v636_v14 = vmax.f32 %v456_v24, 0.0  ;;  %v638_v52 = vmax.f32 %v569_v18, 0.0  ;;  %v573_v15 = vadd.f32 %v572_v21, %v2719_v4 }
 0x171   :  { %v639_v49 = vmax.f32 %v458_v2, 0.0  ;;  %1218 = vmatprep.subr.bf16.mxu0 %v2654_v28  ;;  %v641_v19 = vmax.f32 %v571_v13, 0.0 }
 0x172   :  { %v640_v61 = vmax.f32 %v460_v25, 0.0  ;;  %v642_v27 = vmax.f32 %v573_v15, 0.0 }
 0x173   :  { %v679_v16 = vpack.c.bf16 %v639_v49, %v635_v12  ;;  %v681_v23 = vpack.c.bf16 %v641_v19, %v637_v60 }
 0x174   :  { %v680_v20 = vpack.c.bf16 %v640_v61, %v636_v14  ;;  %1219 = vmatpush1.bf16.msra.mxu0 %v2656_v29  ;;  %v463_v1 = vpop.f32.mrb[24].mxu0  ;;  %v682_v56 = vpack.c.bf16 %v642_v27, %v638_v52  ;;  %v576_v22 = vpop.f32.mrb[24].mxu1 }
 0x175   :  { %v464_v46 = vadd.f32 %v463_v1, %v2707_v50  ;;  %v465_v51 = vpop.f32.mrb[25].mxu0  ;;  %1220 = vmatprep.subr.bf16.mxu0 %v2660_v30  ;;  %v577_v3 = vadd.f32 %v576_v22, %v2716_v63  ;;  %v578_v43 = vpop.f32.mrb[25].mxu1 }
 0x176   :  { %v466_v28 = vadd.f32 %v465_v51, %v2712_v54  ;;  %v467_v57 = vpop.f32.mrb[26].mxu0  ;;  %1169 = vmatprep.mubr.bf16.mxu0 %v680_v20  ;;  %v579_v24 = vadd.f32 %v578_v43, %v2719_v4  ;;  %v580_v30 = vpop.f32.mrb[26].mxu1  ;;  %1282 = vmatprep.mubr.bf16.mxu1 %v682_v56 }
 0x177   :  { %v468_v59 = vadd.f32 %v467_v57, %v2707_v50  ;;  %v469_v62 = vpop.f32.mrb[27].mxu0  ;;  %1170 = vmatmul.mubr.bf16.gmra.mrb[52].mxu0 %v679_v16  ;;  %v643_v53 = vmax.f32 %v464_v46, 0.0  ;;  %v645_v2 = vmax.f32 %v577_v3, 0.0  ;;  %v581_v58 = vadd.f32 %v580_v30, %v2716_v63  ;;  %v582_v8 = vpop.f32.mrb[27].mxu1  ;;  %1283 = vmatmul.mubr.bf16.gmra.mrb[36].mxu1 %v681_v23  ;;  %v755_v30 = vld [vmem:[%s3000_s4] sm:$0x3] }
 0x178   :  { %v470_v29 = vadd.f32 %v469_v62, %v2712_v54  ;;  %1221 = vmatpush1.bf16.msra.mxu0 %v2662_v31  ;;  %v644_v11 = vmax.f32 %v466_v28, 0.0  ;;  %v646_v18 = vmax.f32 %v579_v24, 0.0  ;;  %v583_v26 = vadd.f32 %v582_v8, %v2719_v4 }
 0x179   :  { %v647_v17 = vmax.f32 %v468_v59, 0.0  ;;  %1222 = vmatprep.subr.bf16.mxu0 %v2666_v32  ;;  %v649_v49 = vmax.f32 %v581_v58, 0.0 }
 0x17a   :  { %v648_v25 = vmax.f32 %v470_v29, 0.0  ;;  %v650_v31 = vmax.f32 %v583_v26, 0.0 }
 0x17b   :  { %v683_v12 = vpack.c.bf16 %v647_v17, %v643_v53  ;;  %v685_v21 = vpack.c.bf16 %v649_v49, %v645_v2  ;;  %v2842_v53 = vrot.slane %v755_v30, %v2700_v45  ;;  %v2846_v17 = vrot.slane %v755_v30, %v147_v48 }
 0x17c   :  { %v684_v60 = vpack.c.bf16 %v648_v25, %v644_v11  ;;  %1223 = vmatpush1.bf16.msra.mxu0 %v2668_v33  ;;  %v473_v13 = vpop.f32.mrb[28].mxu0  ;;  %v686_v52 = vpack.c.bf16 %v650_v31, %v646_v18  ;;  %v586_v16 = vpop.f32.mrb[28].mxu1 }
 0x17d   :  { %v474_v14 = vadd.f32 %v473_v13, %v2707_v50  ;;  %v475_v61 = vpop.f32.mrb[29].mxu0  ;;  %1224 = vmatprep.subr.bf16.mxu0 %v2672_v34  ;;  %v587_v20 = vadd.f32 %v586_v16, %v2716_v63  ;;  %v588_v1 = vpop.f32.mrb[29].mxu1 }
 0x17e   :  { %v476_v32 = vadd.f32 %v475_v61, %v2712_v54  ;;  %v477_v15 = vpop.f32.mrb[30].mxu0  ;;  %1179 = vmatprep.mubr.bf16.mxu0 %v684_v60  ;;  %v589_v23 = vadd.f32 %v588_v1, %v2719_v4  ;;  %v590_v34 = vpop.f32.mrb[30].mxu1  ;;  %1292 = vmatprep.mubr.bf16.mxu1 %v686_v52 }
 0x17f   :  { %v478_v19 = vadd.f32 %v477_v15, %v2707_v50  ;;  %v479_v27 = vpop.f32.mrb[31].mxu0  ;;  %1180 = vmatmul.mubr.bf16.gmra.mrb[56].mxu0 %v683_v12  ;;  %v651_v46 = vmax.f32 %v474_v14, 0.0  ;;  %v653_v56 = vmax.f32 %v587_v20, 0.0  ;;  %v591_v28 = vadd.f32 %v590_v34, %v2716_v63  ;;  %v592_v57 = vpop.f32.mrb[31].mxu1  ;;  %1293 = vmatmul.mubr.bf16.gmra.mrb[40].mxu1 %v685_v21  ;;  %v2334_v63 = vld [vmem:[#allocation9 + $0x58] sm:$0xff]  }
 0x180   :  { %v480_v33 = vadd.f32 %v479_v27, %v2712_v54  ;;  %1225 = vmatpush1.bf16.msra.mxu0 %v2674_v35  ;;  %v652_v50 = vmax.f32 %v476_v32, 0.0  ;;  %v654_v59 = vmax.f32 %v589_v23, 0.0  ;;  %v593_v54 = vadd.f32 %v592_v57, %v2719_v4  ;;  %v2335_v4 = vld [vmem:[#allocation9 + $0x18] sm:$0xff]  }
 0x181   :  { %v655_v51 = vmax.f32 %v478_v19, 0.0  ;;  %1226 = vmatprep.subr.bf16.mxu0 %v2678_v36  ;;  %v657_v62 = vmax.f32 %v591_v28, 0.0  ;;  %v2328_v36 = vld [vmem:[#allocation9 + $0x40] sm:$0xff]  }
 0x182   :  { %v656_v22 = vmax.f32 %v480_v33, 0.0  ;;  %v658_v35 = vmax.f32 %v593_v54, 0.0  ;;  %2002 = vmatprep.subr.bf16.mxu1 %v2328_v36 }
 0x183   :  { %v687_v3 = vpack.c.bf16 %v655_v51, %v651_v46  ;;  %v689_v29 = vpack.c.bf16 %v657_v62, %v653_v56 }
 0x184   :  { %v688_v43 = vpack.c.bf16 %v656_v22, %v652_v50  ;;  %1227 = vmatpush1.bf16.msra.mxu0 %v2680_v37  ;;  %v690_v24 = vpack.c.bf16 %v658_v35, %v654_v59  ;;  %v2329_v37 = vld [vmem:[#allocation9] sm:$0xff]  }
 0x185   :  { %1228 = vmatprep.subr.bf16.mxu0 %v2684_v38  ;;  %2003 = vmatpush3.bf16.msra.mxu1 %v2329_v37  ;;  %v2330_v38 = vld [vmem:[#allocation9 + $0x48] sm:$0xff]  }
 0x186   :  { %1189 = vmatprep.mubr.bf16.mxu0 %v688_v43  ;;  %1302 = vmatprep.mubr.bf16.mxu1 %v690_v24 }
 0x187   :  { %1190 = vmatmul.mubr.bf16.gmra.mrb[60].mxu0 %v687_v3  ;;  %1303 = vmatmul.mubr.bf16.gmra.mrb[44].mxu1 %v689_v29 }
 0x188   :  { %1229 = vmatpush1.bf16.msra.mxu0 %v2686_v39  ;;  %1232 = vmatprep.mubr.bf16.mxu0 %v2731_v7  ;;  %v2331_v39 = vld [vmem:[#allocation9 + $0x8] sm:$0xff]   ;;  %v2337_v7 = vld [vmem:[#allocation9 + $0x20] sm:$0xff]  }
 0x189   :  { %1230 = vmatprep.subr.bf16.mxu0 %v2690_v40  ;;  %2004 = vmatprep.subr.bf16.mxu1 %v2330_v38  ;;  %v2332_v40 = vld [vmem:[#allocation9 + $0x50] sm:$0xff]  }
 0x18a   :  { %2005 = vmatpush3.bf16.msra.mxu1 %v2331_v39 }
 0x18b   :  { %2006 = vmatprep.subr.bf16.mxu1 %v2332_v40 }
 0x18c   :  { %1231 = vmatpush1.bf16.msra.mxu0 %v2692_v41  ;;  %v2333_v41 = vld [vmem:[#allocation9 + $0x10] sm:$0xff]  }
 0x18e   :  { %2007 = vmatpush3.bf16.msra.mxu1 %v2333_v41 }
 0x18f   :  { %1233 = vmatmul.mubr.bf16.vlgmr.msra.gmra.mrb[32].mxu0 %v2728_v6  ;;  %2008 = vmatprep.subr.bf16.mxu1 %v2334_v63  ;;  %v2336_v6 = vld [vmem:[#allocation9 + $0x60] sm:$0xff]  }
 0x190   :  { %1242 = vmatprep.mubr.bf16.mxu0 %v2747_v9  ;;  %v2339_v9 = vld [vmem:[#allocation9 + $0x28] sm:$0xff]  }
 0x192   :  { %2009 = vmatpush3.bf16.msra.mxu1 %v2335_v4 }
 0x193   :  { %2010 = vmatprep.subr.bf16.mxu1 %v2336_v6 }
 0x196   :  { %2011 = vmatpush3.bf16.msra.mxu1 %v2337_v7 }
 0x197   :  { %1243 = vmatmul.mubr.bf16.gmra.mrb[36].mxu0 %v2744_v47  ;;  %v2338_v47 = vld [vmem:[#allocation9 + $0x68] sm:$0xff]  }
 0x198   :  { %1252 = vmatprep.mubr.bf16.mxu0 %v2763_v10  ;;  %2012 = vmatprep.subr.bf16.mxu1 %v2338_v47  ;;  %v2341_v10 = vld [vmem:[#allocation9 + $0x30] sm:$0xff]  }
 0x19a   :  { %2013 = vmatpush3.bf16.msra.mxu1 %v2339_v9 }
 0x19f   :  { %1253 = vmatmul.mubr.bf16.gmra.mrb[40].mxu0 %v2760_v55  ;;  %v2340_v55 = vld [vmem:[#allocation9 + $0x70] sm:$0xff]  }
 0x1a0   :  { %1262 = vmatprep.mubr.bf16.mxu0 %v2779_v0  ;;  %2014 = vmatprep.subr.bf16.mxu1 %v2340_v55  ;;  %v2343_v0 = vld [vmem:[#allocation9 + $0x38] sm:$0xff]  }
 0x1a1   :  { %2015 = vmatpush3.bf16.msra.mxu1 %v2341_v10 }
 0x1a7   :  { %1263 = vmatmul.mubr.bf16.gmra.mrb[44].mxu0 %v2775_v5  ;;  %v2342_v5 = vld [vmem:[#allocation9 + $0x78] sm:$0xff]  }
 0x1a8   :  { %2016 = vmatprep.subr.bf16.mxu1 %v2342_v5 }
 0x1a9   :  { %2017 = vmatpush3.bf16.msra.mxu1 %v2343_v0 }
 0x242   :  { %v1161_v2 = vpop.f32.mrb[48].mxu0  ;;  %v1274_v18 = vpop.f32.mrb[32].mxu1 }
 0x243   :  { %v1162_v58 = vadd.f32 %v1161_v2, %v2842_v53  ;;  %v1163_v8 = vpop.f32.mrb[49].mxu0  ;;  %v1276_v60 = vpop.f32.mrb[33].mxu1 }
 0x244   :  { %v1164_v11 = vadd.f32 %v1163_v8, %v2846_v17  ;;  %v1165_v25 = vpop.f32.mrb[50].mxu0  ;;  %v1278_v21 = vpop.f32.mrb[34].mxu1 }
 0x245   :  { %v1166_v26 = vadd.f32 %v1165_v25, %v2842_v53  ;;  %v1275_v12 = vadd.f32 %v1274_v18, %v1162_v58  ;;  %v1167_v49 = vpop.f32.mrb[51].mxu0  ;;  %v1280_v48 = vpop.f32.mrb[35].mxu1 }
 0x246   :  { %v1168_v31 = vadd.f32 %v1167_v49, %v2846_v17  ;;  %v1277_v13 = vadd.f32 %v1276_v60, %v1164_v11 }
 0x247   :  { %v1279_v14 = vadd.f32 %v1278_v21, %v1166_v26  ;;  %v1329_v52 = vmax.f32 %v1275_v12, 0.0 }
 0x248   :  { %v1281_v61 = vadd.f32 %v1280_v48, %v1168_v31  ;;  %v1330_v15 = vmax.f32 %v1277_v13, 0.0 }
 0x249   :  { %v1331_v32 = vmax.f32 %v1279_v14, 0.0 }
 0x24a   :  { %v1332_v16 = vmax.f32 %v1281_v61, 0.0  ;;  %v1171_v19 = vpop.f32.mrb[52].mxu0  ;;  %v1284_v46 = vpop.f32.mrb[36].mxu1 }
 0x24b   :  { %v2852_v20 = vpack.c.bf16 %v1331_v32, %v1329_v52  ;;  %v1172_v27 = vadd.f32 %v1171_v19, %v2842_v53  ;;  %v1173_v1 = vpop.f32.mrb[53].mxu0  ;;  %v1286_v57 = vpop.f32.mrb[37].mxu1 }
 0x24c   :  { %v2855_v33 = vpack.c.bf16 %v1332_v16, %v1330_v15  ;;  %v1174_v23 = vadd.f32 %v1173_v1, %v2846_v17  ;;  %v1175_v34 = vpop.f32.mrb[54].mxu0  ;;  %v1288_v59 = vpop.f32.mrb[38].mxu1 }
 0x24d   :  { %v1176_v51 = vadd.f32 %v1175_v34, %v2842_v53  ;;  %v1285_v56 = vadd.f32 %v1284_v46, %v1172_v27  ;;  %v1177_v28 = vpop.f32.mrb[55].mxu0  ;;  %v1290_v3 = vpop.f32.mrb[39].mxu1 }
 0x24e   :  { %v1178_v50 = vadd.f32 %v1177_v28, %v2846_v17  ;;  %v1287_v22 = vadd.f32 %v1286_v57, %v1174_v23 }
 0x24f   :  { %v1289_v54 = vadd.f32 %v1288_v59, %v1176_v51  ;;  %v1333_v43 = vmax.f32 %v1285_v56, 0.0 }
 0x250   :  { %v1291_v62 = vadd.f32 %v1290_v3, %v1178_v50  ;;  %v1334_v29 = vmax.f32 %v1287_v22, 0.0 }
 0x251   :  { %v1335_v35 = vmax.f32 %v1289_v54, 0.0 }
 0x252   :  { %v1336_v24 = vmax.f32 %v1291_v62, 0.0  ;;  %v1181_v36 = vpop.f32.mrb[56].mxu0  ;;  %v1294_v4 = vpop.f32.mrb[40].mxu1 }
 0x253   :  { %v2860_v37 = vpack.c.bf16 %v1335_v35, %v1333_v43  ;;  %v1182_v38 = vadd.f32 %v1181_v36, %v2842_v53  ;;  %v1183_v39 = vpop.f32.mrb[57].mxu0  ;;  %v1296_v9 = vpop.f32.mrb[41].mxu1 }
 0x254   :  { %v2863_v40 = vpack.c.bf16 %v1336_v24, %v1334_v29  ;;  %v1184_v41 = vadd.f32 %v1183_v39, %v2846_v17  ;;  %v1185_v63 = vpop.f32.mrb[58].mxu0  ;;  %v1298_v5 = vpop.f32.mrb[42].mxu1 }
 0x255   :  { %v1186_v6 = vadd.f32 %v1185_v63, %v2842_v53  ;;  %v1295_v7 = vadd.f32 %v1294_v4, %v1182_v38  ;;  %v1187_v47 = vpop.f32.mrb[59].mxu0  ;;  %v1300_v30 = vpop.f32.mrb[43].mxu1 }
 0x256   :  { %v1188_v55 = vadd.f32 %v1187_v47, %v2846_v17  ;;  %v1297_v10 = vadd.f32 %v1296_v9, %v1184_v41 }
 0x257   :  { %v1299_v0 = vadd.f32 %v1298_v5, %v1186_v6  ;;  %v1337_v58 = vmax.f32 %v1295_v7, 0.0 }
 0x258   :  { %v1301_v2 = vadd.f32 %v1300_v30, %v1188_v55  ;;  %v1338_v11 = vmax.f32 %v1297_v10, 0.0 }
 0x259   :  { %v1339_v8 = vmax.f32 %v1299_v0, 0.0 }
 0x25a   :  { %v1340_v25 = vmax.f32 %v1301_v2, 0.0  ;;  %v1191_v18 = vpop.f32.mrb[60].mxu0  ;;  %v1304_v21 = vpop.f32.mrb[44].mxu1 }
 0x25b   :  { %v2868_v26 = vpack.c.bf16 %v1339_v8, %v1337_v58  ;;  %v1192_v12 = vadd.f32 %v1191_v18, %v2842_v53  ;;  %v1193_v49 = vpop.f32.mrb[61].mxu0  ;;  %v1306_v52 = vpop.f32.mrb[45].mxu1 }
 0x25c   :  { %v2871_v60 = vpack.c.bf16 %v1340_v25, %v1338_v11  ;;  %v1194_v31 = vadd.f32 %v1193_v49, %v2846_v17  ;;  %v1195_v13 = vpop.f32.mrb[62].mxu0  ;;  %v1308_v16 = vpop.f32.mrb[46].mxu1 }
 0x25d   :  { %v1196_v14 = vadd.f32 %v1195_v13, %v2842_v53  ;;  %v1305_v48 = vadd.f32 %v1304_v21, %v1192_v12  ;;  %v1197_v61 = vpop.f32.mrb[63].mxu0  ;;  %v1310_v27 = vpop.f32.mrb[47].mxu1 }
 0x25e   :  { %v1198_v32 = vadd.f32 %v1197_v61, %v2846_v17  ;;  %v1307_v15 = vadd.f32 %v1306_v52, %v1194_v31 }
 0x25f   :  { %v1309_v19 = vadd.f32 %v1308_v16, %v1196_v14  ;;  %v1341_v23 = vmax.f32 %v1305_v48, 0.0 }
 0x260   :  { %v1311_v1 = vadd.f32 %v1310_v27, %v1198_v32  ;;  %v1342_v46 = vmax.f32 %v1307_v15, 0.0 }
 0x261   :  { %v1343_v34 = vmax.f32 %v1309_v19, 0.0 }
 0x262   :  { %v1344_v51 = vmax.f32 %v1311_v1, 0.0  ;;  %v1234_v56 = vpop.f32.mrb[32].mxu0 }
 0x263   :  { %v2876_v28 = vpack.c.bf16 %v1343_v34, %v1341_v23  ;;  %v2098_v57 = vadd.f32 %v1234_v56, %v2842_v53  ;;  %v1236_v50 = vpop.f32.mrb[33].mxu0 }
 0x264   :  { %v2879_v22 = vpack.c.bf16 %v1344_v51, %v1342_v46  ;;  %v2099_v59 = vadd.f32 %v1236_v50, %v2846_v17  ;;  %v1238_v54 = vpop.f32.mrb[34].mxu0 }
 0x265   :  { %v2100_v3 = vadd.f32 %v1238_v54, %v2842_v53  ;;  %v1240_v62 = vpop.f32.mrb[35].mxu0  ;;  %v1313_v35 = vmax.f32 %v2098_v57, 0.0 }
 0x266   :  { %v2101_v43 = vadd.f32 %v1240_v62, %v2846_v17  ;;  %v1314_v24 = vmax.f32 %v2099_v59, 0.0 }
 0x267   :  { %v1315_v29 = vmax.f32 %v2100_v3, 0.0 }
 0x268   :  { %v1316_v36 = vmax.f32 %v2101_v43, 0.0 }
 0x269   :  { %v1345_v38 = vpack.c.bf16 %v1315_v29, %v1313_v35 }
 0x26a   :  { %v1346_v39 = vpack.c.bf16 %v1316_v36, %v1314_v24  ;;  %v1244_v41 = vpop.f32.mrb[36].mxu0 }
 0x26b   :  { %v2102_v63 = vadd.f32 %v1244_v41, %v2842_v53  ;;  %v1246_v4 = vpop.f32.mrb[37].mxu0 }
 0x26c   :  { %v2103_v6 = vadd.f32 %v1246_v4, %v2846_v17  ;;  %v1248_v7 = vpop.f32.mrb[38].mxu0  ;;  %1528 = vmatprep.mubr.bf16.mxu1 %v1346_v39 }
 0x26d   :  { %v2104_v47 = vadd.f32 %v1248_v7, %v2842_v53  ;;  %v1250_v9 = vpop.f32.mrb[39].mxu0  ;;  %1529 = vmatmul.mubr.bf16.vlgmr.msra.gmra.mrb[48].mxu1 %v1345_v38  ;;  %v1317_v10 = vmax.f32 %v2102_v63, 0.0 }
 0x26e   :  { %v2105_v55 = vadd.f32 %v1250_v9, %v2846_v17  ;;  %v1318_v0 = vmax.f32 %v2103_v6, 0.0 }
 0x26f   :  { %v1319_v5 = vmax.f32 %v2104_v47, 0.0 }
 0x270   :  { %v1320_v30 = vmax.f32 %v2105_v55, 0.0 }
 0x271   :  { %v1347_v2 = vpack.c.bf16 %v1319_v5, %v1317_v10 }
 0x272   :  { %v1348_v58 = vpack.c.bf16 %v1320_v30, %v1318_v0  ;;  %v1254_v8 = vpop.f32.mrb[40].mxu0 }
 0x273   :  { %v2106_v11 = vadd.f32 %v1254_v8, %v2842_v53  ;;  %v1256_v25 = vpop.f32.mrb[41].mxu0 }
 0x274   :  { %v2107_v18 = vadd.f32 %v1256_v25, %v2846_v17  ;;  %v1258_v12 = vpop.f32.mrb[42].mxu0  ;;  %1536 = vmatprep.mubr.bf16.mxu1 %v1348_v58 }
 0x275   :  { %v2108_v49 = vadd.f32 %v1258_v12, %v2842_v53  ;;  %v1260_v31 = vpop.f32.mrb[43].mxu0  ;;  %1537 = vmatmul.mubr.bf16.gmra.mrb[52].mxu1 %v1347_v2  ;;  %v1321_v21 = vmax.f32 %v2106_v11, 0.0 }
 0x276   :  { %v2109_v13 = vadd.f32 %v1260_v31, %v2846_v17  ;;  %v1322_v48 = vmax.f32 %v2107_v18, 0.0 }
 0x277   :  { %v1323_v14 = vmax.f32 %v2108_v49, 0.0 }
 0x278   :  { %v1324_v61 = vmax.f32 %v2109_v13, 0.0 }
 0x279   :  { %v1349_v52 = vpack.c.bf16 %v1323_v14, %v1321_v21 }
 0x27a   :  { %v1350_v32 = vpack.c.bf16 %v1324_v61, %v1322_v48  ;;  %v1264_v15 = vpop.f32.mrb[44].mxu0 }
 0x27b   :  { %v2110_v16 = vadd.f32 %v1264_v15, %v2842_v53  ;;  %v1266_v19 = vpop.f32.mrb[45].mxu0 }
 0x27c   :  { %v2111_v27 = vadd.f32 %v1266_v19, %v2846_v17  ;;  %v1268_v1 = vpop.f32.mrb[46].mxu0  ;;  %1544 = vmatprep.mubr.bf16.mxu1 %v1350_v32 }
 0x27d   :  { %v2112_v23 = vadd.f32 %v1268_v1, %v2842_v53  ;;  %v1270_v34 = vpop.f32.mrb[47].mxu0  ;;  %1545 = vmatmul.mubr.bf16.gmra.mrb[56].mxu1 %v1349_v52  ;;  %v1325_v51 = vmax.f32 %v2110_v16, 0.0  ;;  %v1609_v53 = vld [vmem:[%s3003_s7] sm:$0x1] }
 0x27e   :  { %v2113_v46 = vadd.f32 %v1270_v34, %v2846_v17  ;;  %v1326_v57 = vmax.f32 %v2111_v27, 0.0 }
 0x27f   :  { %v1327_v56 = vmax.f32 %v2112_v23, 0.0 }
 0x280   :  { %v1328_v50 = vmax.f32 %v2113_v46, 0.0 }
 0x281   :  { %v1351_v59 = vpack.c.bf16 %v1327_v56, %v1325_v51 }
 0x282   :  { %v1352_v54 = vpack.c.bf16 %v1328_v50, %v1326_v57 }
 0x284   :  { %1552 = vmatprep.mubr.bf16.mxu1 %v1352_v54 }
 0x285   :  { %1553 = vmatmul.mubr.bf16.gmra.mrb[60].mxu1 %v1351_v59 }
 0x286   :  { %1560 = vmatprep.mubr.bf16.mxu1 %v2855_v33  ;;  %v1610_v33 = vunpack.c.l.bf16 %v1609_v53 }
 0x28d   :  { %1561 = vmatmul.mubr.bf16.gmra.mrb[64].mxu1 %v2852_v20  ;;  %v2910_v20 = vld [vmem:[%s3002_s6] ss:$0 sm:$0xff]  ;;  %s2473_s6 = smov [#allocation11]  }
 0x28e   :  { %1568 = vmatprep.mubr.bf16.mxu1 %v2863_v40  ;;  %s1869_s7 = sshll.u32 %s2473_s6, 4  ;;  %s1870_s7 = int_to_ptr.vmem [resolvable:$true] %s1869_s7 }
 0x28f   :  { %s2432_s21 = scalar_lea.vmem %s1870_s7, 16  ;;  %s2436_s22 = scalar_lea.vmem %s1870_s7, 32 }
 0x290   :  { %p2433_p4 = scmp.ne.s32.totalorder %s1870_s7, %s2432_s21  ;;  %p2437_p5 = scmp.lt.s32.totalorder %s1870_s7, %s1870_s7 }
 0x291   :  { %p2438_p6 = scmp.lt.s32.totalorder %s2436_s22, %s2432_s21 }
 0x293   :  { %p2439_p7 = por %p2438_p6, %p2437_p5 }
 0x295   :  { %1569 = vmatmul.mubr.bf16.gmra.mrb[68].mxu1 %v2860_v37  ;;  %p2440_p8 = pnand %p2439_p7, %p2433_p4 }
 0x296   :  { %1576 = vmatprep.mubr.bf16.mxu1 %v2871_v60 }
 0x29d   :  { %1577 = vmatmul.mubr.bf16.gmra.mrb[72].mxu1 %v2868_v26 }
 0x29e   :  { %1584 = vmatprep.mubr.bf16.mxu1 %v2879_v22 }
 0x2a5   :  { %1585 = vmatmul.mubr.bf16.gmra.mrb[76].mxu1 %v2876_v28  ;;  %v2914_v28 = vrot.slane %v1610_v33, %v2700_v45 }
 0x340   :  { %v2018_v17 = vpop.f32.mrb[48].mxu1 }
 0x341   :  { %v2019_v3 = vpop.f32.mrb[49].mxu1 }
 0x342   :  { %v2020_v37 = vadd.f32 %v2019_v3, %v2018_v17  ;;  %v2021_v40 = vpop.f32.mrb[50].mxu1 }
 0x343   :  { %v2022_v60 = vpop.f32.mrb[51].mxu1 }
 0x344   :  { %v2023_v26 = vadd.f32 %v2022_v60, %v2021_v40  ;;  %v1531_v22 = vadd.f32 %v2020_v37, %v2910_v20 }
 0x346   :  { %v1534_v62 = vadd.f32 %v2023_v26, %v2910_v20  ;;  %v1593_v43 = vmax.f32 %v1531_v22, 0.0 }
 0x348   :  { %v1594_v35 = vmax.f32 %v1534_v62, 0.0  ;;  %v2024_v29 = vpop.f32.mrb[52].mxu1  ;;  %v1615_v24 = vmul.f32 %v2914_v28, %v1593_v43 }
 0x349   :  { %v2025_v36 = vpop.f32.mrb[53].mxu1 }
 0x34a   :  { %v2026_v38 = vadd.f32 %v2025_v36, %v2024_v29  ;;  %v2027_v39 = vpop.f32.mrb[54].mxu1  ;;  %1631 = vadd.xlane.f32.xlu0 %v1615_v24  ;;  %v1616_v4 = vmul.f32 %v2914_v28, %v1594_v35 }
 0x34b   :  { %v2028_v41 = vpop.f32.mrb[55].mxu1 }
 0x34c   :  { %v2029_v63 = vadd.f32 %v2028_v41, %v2027_v39  ;;  %v1539_v6 = vadd.f32 %v2026_v38, %v2910_v20 }
 0x34e   :  { %v1542_v45 = vadd.f32 %v2029_v63, %v2910_v20  ;;  %1633 = vadd.xlane.f32.xlu0 %v1616_v4  ;;  %v1595_v7 = vmax.f32 %v1539_v6, 0.0 }
 0x350   :  { %v1596_v47 = vmax.f32 %v1542_v45, 0.0  ;;  %v2030_v9 = vpop.f32.mrb[56].mxu1  ;;  %v1617_v55 = vmul.f32 %v2914_v28, %v1595_v7 }
 0x351   :  { %v2031_v10 = vpop.f32.mrb[57].mxu1 }
 0x352   :  { %v2032_v5 = vadd.f32 %v2031_v10, %v2030_v9  ;;  %v2033_v0 = vpop.f32.mrb[58].mxu1  ;;  %1635 = vadd.xlane.f32.xlu1 %v1617_v55  ;;  %v1618_v8 = vmul.f32 %v2914_v28, %v1596_v47 }
 0x353   :  { %v2034_v30 = vpop.f32.mrb[59].mxu1 }
 0x354   :  { %v1547_v2 = vadd.f32 %v2032_v5, %v2910_v20  ;;  %v2035_v58 = vadd.f32 %v2034_v30, %v2033_v0 }
 0x356   :  { %v1597_v11 = vmax.f32 %v1547_v2, 0.0  ;;  %v1550_v25 = vadd.f32 %v2035_v58, %v2910_v20  ;;  %1637 = vadd.xlane.f32.xlu1 %v1618_v8 }
 0x358   :  { %v1598_v18 = vmax.f32 %v1550_v25, 0.0  ;;  %v2036_v12 = vpop.f32.mrb[60].mxu1  ;;  %v1619_v49 = vmul.f32 %v2914_v28, %v1597_v11 }
 0x359   :  { %v2037_v31 = vpop.f32.mrb[61].mxu1 }
 0x35a   :  { %v2038_v13 = vadd.f32 %v2037_v31, %v2036_v12  ;;  %v2039_v21 = vpop.f32.mrb[62].mxu1  ;;  %1639 = vadd.xlane.f32.xlu0 %v1619_v49  ;;  %v1620_v14 = vmul.f32 %v2914_v28, %v1598_v18  ;;  %v2001_v31 = vld [vmem:[#allocation2] ss:$0 sm:$0xff] }
 0x35b   :  { %v2040_v48 = vpop.f32.mrb[63].mxu1 }
 0x35c   :  { %v1555_v61 = vadd.f32 %v2038_v13, %v2910_v20  ;;  %v2041_v52 = vadd.f32 %v2040_v48, %v2039_v21  ;;  %1641 = vadd.xlane.f32.xlu1 %v1620_v14 }
 0x35e   :  { %v1599_v32 = vmax.f32 %v1555_v61, 0.0  ;;  %v1558_v15 = vadd.f32 %v2041_v52, %v2910_v20 }
 0x360   :  { %v1600_v16 = vmax.f32 %v1558_v15, 0.0  ;;  %v2042_v19 = vpop.f32.mrb[64].mxu1  ;;  %v1621_v27 = vmul.f32 %v2914_v28, %v1599_v32 }
 0x361   :  { %v2043_v1 = vpop.f32.mrb[65].mxu1 }
 0x362   :  { %v2044_v23 = vadd.f32 %v2043_v1, %v2042_v19  ;;  %1643 = vadd.xlane.f32.xlu0 %v1621_v27  ;;  %v2045_v34 = vpop.f32.mrb[66].mxu1  ;;  %v1622_v46 = vmul.f32 %v2914_v28, %v1600_v16 }
 0x363   :  { %v2046_v51 = vpop.f32.mrb[67].mxu1 }
 0x364   :  { %v1563_v56 = vadd.f32 %v2044_v23, %v2910_v20  ;;  %v2047_v57 = vadd.f32 %v2046_v51, %v2045_v34  ;;  %1645 = vadd.xlane.f32.xlu1 %v1622_v46 }
 0x366   :  { %v1601_v50 = vmax.f32 %v1563_v56, 0.0  ;;  %v1566_v59 = vadd.f32 %v2047_v57, %v2910_v20 }
 0x368   :  { %v1602_v54 = vmax.f32 %v1566_v59, 0.0  ;;  %v2048_v53 = vpop.f32.mrb[68].mxu1  ;;  %v1623_v17 = vmul.f32 %v2914_v28, %v1601_v50 }
 0x369   :  { %v2049_v33 = vpop.f32.mrb[69].mxu1 }
 0x36a   :  { %v2050_v3 = vadd.f32 %v2049_v33, %v2048_v53  ;;  %v2051_v37 = vpop.f32.mrb[70].mxu1  ;;  %1647 = vadd.xlane.f32.xlu0 %v1623_v17  ;;  %v1624_v40 = vmul.f32 %v2914_v28, %v1602_v54 }
 0x36b   :  { %v2052_v60 = vpop.f32.mrb[71].mxu1 }
 0x36c   :  { %v1571_v26 = vadd.f32 %v2050_v3, %v2910_v20  ;;  %v2053_v22 = vadd.f32 %v2052_v60, %v2051_v37  ;;  %1649 = vadd.xlane.f32.xlu1 %v1624_v40 }
 0x36e   :  { %v1603_v62 = vmax.f32 %v1571_v26, 0.0  ;;  %v1574_v43 = vadd.f32 %v2053_v22, %v2910_v20 }
 0x370   :  { %v1604_v35 = vmax.f32 %v1574_v43, 0.0  ;;  %v2054_v29 = vpop.f32.mrb[72].mxu1  ;;  %v1625_v24 = vmul.f32 %v2914_v28, %v1603_v62 }
 0x371   :  { %v2055_v36 = vpop.f32.mrb[73].mxu1 }
 0x372   :  { %v2056_v38 = vadd.f32 %v2055_v36, %v2054_v29  ;;  %v2057_v39 = vpop.f32.mrb[74].mxu1  ;;  %1651 = vadd.xlane.f32.xlu0 %v1625_v24  ;;  %v1626_v41 = vmul.f32 %v2914_v28, %v1604_v35  ;;  %v2948_v36 = vand.u32 127, %v141_v42 }
 0x373   :  { %v2058_v63 = vpop.f32.mrb[75].mxu1 }
 0x374   :  { %v1579_v4 = vadd.f32 %v2056_v38, %v2910_v20  ;;  %v2059_v6 = vadd.f32 %v2058_v63, %v2057_v39  ;;  %1653 = vadd.xlane.f32.xlu1 %v1626_v41  ;;  %v1756_v38 = vadd.s32 4294967288, %v2948_v36  ;;  %v1763_v41 = vadd.s32 4294967280, %v2948_v36 }
 0x375   :  { %v1770_v63 = vadd.s32 4294967272, %v2948_v36  ;;  %v1754_v42 = vsub.s32 %v2948_v36, %v2697_v44 }
 0x376   :  { %v1605_v45 = vmax.f32 %v1579_v4, 0.0  ;;  %v1582_v7 = vadd.f32 %v2059_v6, %v2910_v20  ;;  %v1777_v4 = vadd.s32 4294967264, %v2948_v36  ;;  %v1759_v6 = vsub.s32 %v1756_v38, %v2697_v44 }
 0x378   :  { %v1606_v47 = vmax.f32 %v1582_v7, 0.0  ;;  %v2060_v9 = vpop.f32.mrb[76].mxu1  ;;  %v1627_v55 = vmul.f32 %v2914_v28, %v1605_v45  ;;  %v1784_v45 = vadd.s32 4294967256, %v2948_v36  ;;  %v1766_v7 = vsub.s32 %v1763_v41, %v2697_v44 }
 0x379   :  { %v2061_v10 = vpop.f32.mrb[77].mxu1 }
 0x37a   :  { %v2062_v5 = vadd.f32 %v2061_v10, %v2060_v9  ;;  %v2063_v0 = vpop.f32.mrb[78].mxu1  ;;  %1655 = vadd.xlane.f32.xlu0 %v1627_v55  ;;  %v1628_v30 = vmul.f32 %v2914_v28, %v1606_v47  ;;  %v1791_v47 = vadd.s32 4294967248, %v2948_v36  ;;  %v1773_v9 = vsub.s32 %v1770_v63, %v2697_v44 }
 0x37b   :  { %v2064_v2 = vpop.f32.mrb[79].mxu1  ;;  %v1798_v55 = vadd.s32 4294967240, %v2948_v36 }
 0x37c   :  { %v1587_v58 = vadd.f32 %v2062_v5, %v2910_v20  ;;  %v2065_v8 = vadd.f32 %v2064_v2, %v2063_v0  ;;  %1657 = vadd.xlane.f32.xlu1 %v1628_v30  ;;  %v1780_v0 = vsub.s32 %v1777_v4, %v2697_v44  ;;  %v1805_v30 = vadd.s32 4294967232, %v2948_v36 }
 0x37e   :  { %v1607_v11 = vmax.f32 %v1587_v58, 0.0  ;;  %v1590_v25 = vadd.f32 %v2065_v8, %v2910_v20  ;;  %v1787_v58 = vsub.s32 %v1784_v45, %v2697_v44 }
 0x380   :  { %v1608_v18 = vmax.f32 %v1590_v25, 0.0  ;;  %v1629_v12 = vmul.f32 %v2914_v28, %v1607_v11  ;;  %v1794_v11 = vsub.s32 %v1791_v47, %v2697_v44 }
 0x382   :  { %1659 = vadd.xlane.f32.xlu0 %v1629_v12  ;;  %v1630_v49 = vmul.f32 %v2914_v28, %v1608_v18  ;;  %v1801_v12 = vsub.s32 %v1798_v55, %v2697_v44 }
 0x384   :  { %1661 = vadd.xlane.f32.xlu1 %v1630_v49  ;;  %v1812_v49 = vadd.s32 4294967224, %v2948_v36 }
 0x3d7   :  { %v1632_v13 = vpop.xlane.xlu0 %1631 }
 0x3d8   :  { %v1670_v21 = vadd.f32 %v2001_v31, %v1632_v13  ;;  %v1808_v13 = vsub.s32 %v1805_v30, %v2697_v44 }
 0x3da   :  { %1703 = vperm.xlu0 %2174, %v1670_v21   ;;  %v1819_v21 = vadd.s32 4294967216, %v2948_v36 }
 0x3db   :  { %v1634_v14 = vpop.xlane.xlu0 %1633 }
 0x3dc   :  { %v1671_v48 = vadd.f32 %v2001_v31, %v1634_v14 }
 0x3de   :  { %1706 = vperm.xlu1 %2175, %v1671_v48  }
 0x3df   :  { %v1636_v61 = vpop.xlane.xlu1 %1635 }
 0x3e0   :  { %v1672_v52 = vadd.f32 %v2001_v31, %v1636_v61 }
 0x3e2   :  { %1709 = vperm.xlu1 %2175, %v1672_v52  }
 0x3e3   :  { %v1638_v32 = vpop.xlane.xlu1 %1637 }
 0x3e4   :  { %v1673_v15 = vadd.f32 %v2001_v31, %v1638_v32 }
 0x3e6   :  { %1712 = vperm.xlu1 %2175, %v1673_v15  }
 0x3e7   :  { %v1640_v20 = vpop.xlane.xlu0 %1639 }
 0x3e8   :  { %v1674_v16 = vadd.f32 %v2001_v31, %v1640_v20 }
 0x3e9   :  { %v1642_v19 = vpop.xlane.xlu1 %1641 }
 0x3ea   :  { %1715 = vperm.xlu1 %2175, %v1674_v16   ;;  %v1675_v27 = vadd.f32 %v2001_v31, %v1642_v19  ;;  %v1815_v16 = vsub.s32 %v1812_v49, %v2697_v44  ;;  %v1826_v19 = vadd.s32 4294967208, %v2948_v36 }
 0x3ee   :  { %1718 = vperm.xlu1 %2175, %v1675_v27  }
 0x3ef   :  { %v1644_v28 = vpop.xlane.xlu0 %1643 }
 0x3f0   :  { %v1676_v1 = vadd.f32 %v2001_v31, %v1644_v28 }
 0x3f1   :  { %v1646_v23 = vpop.xlane.xlu1 %1645 }
 0x3f2   :  { %1721 = vperm.xlu1 %2175, %v1676_v1   ;;  %v1677_v34 = vadd.f32 %v2001_v31, %v1646_v23  ;;  %v1822_v23 = vsub.s32 %v1819_v21, %v2697_v44 }
 0x3f6   :  { %1724 = vperm.xlu1 %2175, %v1677_v34   ;;  %v1833_v34 = vadd.s32 4294967200, %v2948_v36 }
 0x3f7   :  { %v1648_v46 = vpop.xlane.xlu0 %1647 }
 0x3f8   :  { %v1678_v51 = vadd.f32 %v2001_v31, %v1648_v46 }
 0x3f9   :  { %v1650_v56 = vpop.xlane.xlu1 %1649 }
 0x3fa   :  { %v1679_v57 = vadd.f32 %v2001_v31, %v1650_v56  ;;  %1727 = vperm.xlu1 %2175, %v1678_v51  }
 0x3fc   :  { %1730 = vperm.xlu0 %2174, %v1679_v57  }
 0x3ff   :  { %v1652_v50 = vpop.xlane.xlu0 %1651 }
 0x400   :  { %v1680_v59 = vadd.f32 %v2001_v31, %v1652_v50 }
 0x401   :  { %v1654_v54 = vpop.xlane.xlu1 %1653 }
 0x402   :  { %v1681_v53 = vadd.f32 %v2001_v31, %v1654_v54  ;;  %1733 = vperm.xlu1 %2175, %v1680_v59   ;;  %v1829_v59 = vsub.s32 %v1826_v19, %v2697_v44  ;;  %v1840_v54 = vadd.s32 4294967192, %v2948_v36 }
 0x404   :  { %1736 = vperm.xlu0 %2174, %v1681_v53  }
 0x407   :  { %v1656_v17 = vpop.xlane.xlu0 %1655 }
 0x408   :  { %v1682_v33 = vadd.f32 %v2001_v31, %v1656_v17 }
 0x409   :  { %v1658_v3 = vpop.xlane.xlu1 %1657 }
 0x40a   :  { %v1683_v37 = vadd.f32 %v2001_v31, %v1658_v3  ;;  %1739 = vperm.xlu1 %2175, %v1682_v33   ;;  %v1836_v3 = vsub.s32 %v1833_v34, %v2697_v44 }
 0x40c   :  { %1742 = vperm.xlu0 %2174, %v1683_v37  }
 0x40f   :  { %v1660_v40 = vpop.xlane.xlu0 %1659 }
 0x410   :  { %v1684_v60 = vadd.f32 %v2001_v31, %v1660_v40  ;;  %v1847_v40 = vadd.s32 4294967184, %v2948_v36 }
 0x411   :  { %v1662_v26 = vpop.xlane.xlu1 %1661 }
 0x412   :  { %v1685_v22 = vadd.f32 %v2001_v31, %v1662_v26  ;;  %1745 = vperm.xlu1 %2175, %v1684_v60  }
 0x414   :  { %1748 = vperm.xlu0 %2174, %v1685_v22   ;;  %v1843_v22 = vsub.s32 %v1840_v54, %v2697_v44 }
 0x459   :  { %v1704_v5 = vpop.permute.xlu0 %1703 }
 0x45a   :  { %v1755_v25 = vrot.slane %v1704_v5, %v1754_v42 }
 0x45d   :  { %v1707_v62 = vpop.permute.xlu1 %1706 }
 0x45e   :  { %v1760_v2 = vrot.slane %v1707_v62, %v1759_v6 }
 0x460   :  { %v1762_v14 = vsel %vm1761_vm0, %v1760_v2, %v1755_v25 }
 0x461   :  { %v1710_v43 = vpop.permute.xlu1 %1709 }
 0x462   :  { %v1767_v8 = vrot.slane %v1710_v43, %v1766_v7 }
 0x464   :  { %v1769_v52 = vsel %vm1768_vm1, %v1767_v8, %v1762_v14 }
 0x465   :  { %v1713_v35 = vpop.permute.xlu1 %1712 }
 0x466   :  { %v1774_v18 = vrot.slane %v1713_v35, %v1773_v9 }
 0x468   :  { %v1776_v15 = vsel %vm1775_vm2, %v1774_v18, %v1769_v52 }
 0x469   :  { %v1716_v29 = vpop.permute.xlu1 %1715 }
 0x46a   :  { %v1781_v31 = vrot.slane %v1716_v29, %v1780_v0  ;;  %v1854_v29 = vadd.s32 4294967176, %v2948_v36 }
 0x46c   :  { %v1783_v27 = vsel %vm1782_vm3, %v1781_v31, %v1776_v15  ;;  %v1857_v63 = vsub.s32 %v1854_v29, %v2697_v44 }
 0x46d   :  { %v1719_v24 = vpop.permute.xlu1 %1718 }
 0x46e   :  { %v1788_v48 = vrot.slane %v1719_v24, %v1787_v58  ;;  %v1850_v24 = vsub.s32 %v1847_v40, %v2697_v44 }
 0x470   :  { %v1790_v46 = vsel %vm1789_vm4, %v1788_v48, %v1783_v27 }
 0x471   :  { %v1722_v39 = vpop.permute.xlu1 %1721 }
 0x472   :  { %v1795_v32 = vrot.slane %v1722_v39, %v1794_v11 }
 0x474   :  { %v1797_v56 = vsel %vm1796_vm5, %v1795_v32, %v1790_v46 }
 0x475   :  { %v1725_v10 = vpop.permute.xlu1 %1724 }
 0x476   :  { %v1802_v20 = vrot.slane %v1725_v10, %v1801_v12 }
 0x478   :  { %v1804_v57 = vsel %vm1803_vm6, %v1802_v20, %v1797_v56 }
 0x479   :  { %v1728_v61 = vpop.permute.xlu1 %1727 }
 0x47a   :  { %v1809_v28 = vrot.slane %v1728_v61, %v1808_v13 }
 0x47b   :  { %v1731_v1 = vpop.permute.xlu0 %1730 }
 0x47c   :  { %v1816_v50 = vrot.slane %v1731_v1, %v1815_v16  ;;  %v1811_v53 = vsel %vm1810_vm7, %v1809_v28, %v1804_v57 }
 0x47e   :  { %v1818_v60 = vsel %vm1817_vm8, %v1816_v50, %v1811_v53 }
 0x481   :  { %v1734_v51 = vpop.permute.xlu1 %1733 }
 0x482   :  { %v1823_v17 = vrot.slane %v1734_v51, %v1822_v23 }
 0x483   :  { %v1737_v33 = vpop.permute.xlu0 %1736 }
 0x484   :  { %v1830_v26 = vrot.slane %v1737_v33, %v1829_v59  ;;  %v1825_v62 = vsel %vm1824_vm9, %v1823_v17, %v1818_v60 }
 0x486   :  { %v1832_v38 = vsel %vm1831_vm10, %v1830_v26, %v1825_v62 }
 0x489   :  { %v1740_v37 = vpop.permute.xlu1 %1739 }
 0x48a   :  { %v1837_v43 = vrot.slane %v1740_v37, %v1836_v3 }
 0x48b   :  { %v1743_v35 = vpop.permute.xlu0 %1742 }
 0x48c   :  { %v1844_v39 = vrot.slane %v1743_v35, %v1843_v22  ;;  %v1839_v41 = vsel %vm1838_vm11, %v1837_v43, %v1832_v38 }
 0x48e   :  { %v1846_v45 = vsel %vm1845_vm12, %v1844_v39, %v1839_v41 }
 0x491   :  { %v1746_v4 = vpop.permute.xlu1 %1745 }
 0x492   :  { %v1851_v6 = vrot.slane %v1746_v4, %v1850_v24 }
 0x493   :  { %v1749_v7 = vpop.permute.xlu0 %1748 }
 0x494   :  { %v1858_v47 = vrot.slane %v1749_v7, %v1857_v63  ;;  %v1853_v42 = vsel %vm1852_vm13, %v1851_v6, %v1846_v45 }
 0x496   :  { %v1860_v36 = vsel %vm1859_vm14, %v1858_v47, %v1853_v42 }
 0x497   :  { %1862 = vst [vmem:[#allocation11] sm:$0x1] %v1860_v36 }
 0x498   :  { %2443 = shalt.err (!%p2440_p8)
}
 0x499   :  { %s2444_s0 = scalar_lea.hbm %s3005_s9, 16 }
 0x49a   :  { %p2445_p9 = scmp.ne.s32.totalorder %s3005_s9, %s2444_s0  ;;  %p2448_p10 = scmp.lt.u32.totalorder %s2444_s0, %s3005_s9 }
 0x49c   :  { %p2450_p11 = pnand %p2448_p10, %p2445_p9 }
 0x49e   :  { %2453 = shalt.err (!%p2450_p11)
}
 0x49f   :  { %1872 = dma.vmem_to_hbm [thread:$0]  %s1870_s7, 16, %s3005_s9, [#allocation5]  }
 0x4a0   :  { %2460 = dma.done.wait [#allocation5], 16  }
 0x4a1   :  { %2461 = vsyncadd [#allocation5], 4294967280 }
 0x4a2   :  { %1876 = vsyncpa [#allocation4], 1 }
 0x4a3   :  { %1877 = vsyncpa [#allocation7], 1 }
 0x4a4   :  { %1878 = vsyncpa [#allocation10], 1 }
 0x4a5   :  { %1879 = vsyncpa [#allocation5], 1 }

</bundles_post_ra>
